<compile_context>
chip_gen: v7x
topology: tpu7x:2x2x1
jax: 0.10.0
libtpu: 0.0.40
codegen_flags: <defaults>
</compile_context>

<pallas_src>
import functools

import numpy as np
import jax
import jax.numpy as jnp
from jax import lax
from jax.experimental import pallas as pl
from jax.experimental.pallas import tpu as pltpu

BN_EPS = 1e-5


# ------------------------------ Pallas kernel ------------------------------

def _repsp1d_kernel(x_ref, w_ref, b_ref, o_ref, xpad_ref, *, ks, pad, mult):
    """Fused RepSP1DAttn_DW: ks-tap 1-D depthwise conv + bias (VPU path).

    x_ref:    (Cin, H, Wt)    input block; conv axis = sublane dim, W = lanes
    w_ref:    (ks, Cout)      fused per-tap depthwise weights (SMEM scalars)
    b_ref:    (Cout,)         fused bias (SMEM scalars)
    o_ref:    (Cout, Ho, Wt)  output block
    xpad_ref: (Cin, Hp, Wt)   VMEM scratch with zero halo along the conv axis
    """
    cin, h, wt = x_ref.shape
    cout, ho, _ = o_ref.shape
    hp = xpad_ref.shape[1]

    # Build the conv-axis halo in VMEM (no HBM pre-pad pass in the wrapper).
    if pad > 0:
        xpad_ref[:, :pad, :] = jnp.zeros((cin, pad, wt), jnp.float32)
        xpad_ref[:, h + pad:hp, :] = jnp.zeros((cin, pad, wt), jnp.float32)
    xpad_ref[:, pad:pad + h, :] = x_ref[...].astype(jnp.float32)

    # Depthwise conv on the VPU: out channel o reads input channel o // mult;
    # each tap is a scalar-broadcast multiply-add over the lane-dense W axis.
    for o in range(cout):                              # static, small Cout
        ci = o // mult
        acc = jnp.full((ho, wt), b_ref[o], dtype=jnp.float32)   # bias as init
        for t in range(ks):                            # static, unrolled taps
            acc = acc + w_ref[t, o] * xpad_ref[ci, t:t + ho, :]
        o_ref[o, :, :] = acc.astype(o_ref.dtype)


# ----------------------------- tiling / wrapper -----------------------------

def _vmem_capacity_bytes():
    try:
        return int(pltpu.get_tpu_info().vmem_capacity_bytes)
    except Exception:
        return 64 * 1024 * 1024            # conservative (v7x per-core VMEM)


def _pick_w_tile(w, n, col_bytes, budget):
    """Lane tile along W: full W when it is not 128-aligned, otherwise the
    largest 128-multiple divisor whose per-block VMEM fits the budget."""
    if w % 128 != 0:
        return w                           # full-extent block is always legal
    best, t = 128, 128
    while t <= w:
        if w % t == 0 and t * col_bytes <= budget:
            best = t
        t += 128
    # Keep >= 2 parallel grid steps so both v7x TensorCores get work.
    if n == 1 and best == w and (w // 2) % 128 == 0:
        best = w // 2
    return best


def repsp1d_fused_conv(x_nchw, taps, bias, *, ks, pad, stride, ver,
                       out_dtype=jnp.float32):
    """x_nchw: (N, Cin, H, W) -> (N, Cout, Ho, Wo) in `out_dtype`.

    `taps` is the fused (ks, Cout) depthwise tap table, `bias` the fused
    (Cout,) bias (see fuse_repsp1d).  Pass out_dtype=jnp.bfloat16 to halve the
    writeback bytes when the consumer tolerates it; accumulation stays f32.
    """
    if stride != 1:
        # TODO(synk): strided variant not wired up; AFASeg uses stride=1 here.
        raise NotImplementedError("RepSP1DAttn_DW kernel supports stride=1")
    if not ver:
        # TODO(synk): a conv-along-lane kernel variant would avoid this swap.
        x_nchw = jnp.swapaxes(x_nchw, 2, 3)

    n, cin, h, w = x_nchw.shape
    ntaps, cout = taps.shape
    assert ntaps == ks and cout % cin == 0
    mult = cout // cin
    ho = h + 2 * pad - ks + 1
    hp = h + 2 * pad

    cap = _vmem_capacity_bytes()
    vmem_limit = int(min(cap * 3 // 4, 96 * 1024 * 1024))
    out_isz = jnp.dtype(out_dtype).itemsize
    col_bytes = (2 * cin * h * x_nchw.dtype.itemsize   # input block, 2 buffers
                 + 2 * cout * ho * out_isz             # output block, 2 buffers
                 + cin * hp * 4)                       # padded f32 scratch
    wt = _pick_w_tile(w, n, col_bytes, vmem_limit // 2)
    grid = (n, w // wt)

    out = pl.pallas_call(
        functools.partial(_repsp1d_kernel, ks=ks, pad=pad, mult=mult),
        out_shape=jax.ShapeDtypeStruct((n, cout, ho, w), out_dtype),
        grid=grid,
        in_specs=[
            pl.BlockSpec((None, cin, h, wt), lambda b, j: (b, 0, 0, j)),
            pl.BlockSpec(memory_space=pltpu.MemorySpace.SMEM),   # taps
            pl.BlockSpec(memory_space=pltpu.MemorySpace.SMEM),   # bias
        ],
        out_specs=pl.BlockSpec((None, cout, ho, wt), lambda b, j: (b, 0, 0, j)),
        scratch_shapes=[pltpu.VMEM((cin, hp, wt), jnp.float32)],
        compiler_params=pltpu.CompilerParams(
            dimension_semantics=("parallel", "parallel"),
            vmem_limit_bytes=vmem_limit),
    )(x_nchw, taps.astype(jnp.float32), bias.astype(jnp.float32))

    if not ver:
        out = jnp.swapaxes(out, 2, 3)
    return out


# ------------------------- parameters & BN folding -------------------------

class KeyGen:
    def __init__(self, seed):
        self._key = jax.random.PRNGKey(seed)

    def __call__(self):
        self._key, sub = jax.random.split(self._key)
        return sub


def _bn_params(kg, c):
    return {"gamma": 1.0 + 0.1 * jax.random.normal(kg(), (c,), jnp.float32),
            "beta": 0.05 * jax.random.normal(kg(), (c,), jnp.float32),
            "mean": 0.05 * jax.random.normal(kg(), (c,), jnp.float32),
            "var": 1.0 + 0.1 * jax.random.uniform(kg(), (c,), jnp.float32)}


def init_repsp1d(kg, in_ch, out_ch, ks, pad, stride, ver):
    assert out_ch % in_ch == 0
    assert ks % 2 == 1 and ks >= 5, "branches need taps ks, ks-2, ks-4 >= 1"
    assert pad >= 2, "branch paddings pad, pad-1, pad-2 must be >= 0"
    branches = []
    for k in (ks, ks - 2, ks - 4):
        shape = (out_ch, 1, k, 1) if ver else (out_ch, 1, 1, k)
        wconv = jax.random.normal(kg(), shape, jnp.float32) / np.sqrt(k)
        branches.append({"w": wconv, "k": k, "pad": pad - (ks - k) // 2,
                         "bn": _bn_params(kg, out_ch)})
    return {"in_ch": in_ch, "out_ch": out_ch, "ks": ks, "pad": pad,
            "stride": stride, "ver": ver,
            "branches": branches, "bn_out": _bn_params(kg, out_ch)}


def fuse_repsp1d(p):
    """Fold the three conv+BN branches and the final BN into a single ks-tap
    depthwise tap table (ks, Cout) plus bias (Cout,)."""
    out_ch, ks = p["out_ch"], p["ks"]
    taps = jnp.zeros((out_ch, ks), jnp.float32)
    bias = jnp.zeros((out_ch,), jnp.float32)
    for br in p["branches"]:
        bn = br["bn"]
        s = bn["gamma"] / jnp.sqrt(bn["var"] + BN_EPS)
        t = bn["beta"] - bn["mean"] * s
        w1d = br["w"].reshape(out_ch, br["k"]) * s[:, None]
        off = (ks - br["k"]) // 2
        taps = taps + jnp.pad(w1d, ((0, 0), (off, off)))
        bias = bias + t
    bn = p["bn_out"]
    s = bn["gamma"] / jnp.sqrt(bn["var"] + BN_EPS)
    t = bn["beta"] - bn["mean"] * s
    taps = taps * s[:, None]
    bias = t + s * bias
    return jnp.transpose(taps), bias          # (ks, Cout), (Cout,)


def repsp1d_attn_dw_forward(p, fused, x_nchw):
    """PyTorch-facing forward: NCHW in, NCHW out (no layout round-trips)."""
    taps, bias = fused
    return repsp1d_fused_conv(x_nchw, taps, bias, ks=p["ks"], pad=p["pad"],
                              stride=p["stride"], ver=p["ver"])


# -------------------------- pure-JAX reference path -------------------------

def _bn_apply(x_nchw, bn):
    s = bn["gamma"] / jnp.sqrt(bn["var"] + BN_EPS)
    t = bn["beta"] - bn["mean"] * s
    return x_nchw * s[None, :, None, None] + t[None, :, None, None]


def repsp1d_reference(p, x_nchw):
    """Unfused eval-mode forward: bn(conv(x) + conv1(x) + conv2(x))."""
    acc = None
    for br in p["branches"]:
        if p["ver"]:
            padding = ((br["pad"], br["pad"]), (0, 0))
        else:
            padding = ((0, 0), (br["pad"], br["pad"]))
        y = lax.conv_general_dilated(
            x_nchw, br["w"], window_strides=(1, 1), padding=padding,
            feature_group_count=p["in_ch"],
            dimension_numbers=("NCHW", "OIHW", "NCHW"))
        y = _bn_apply(y, br["bn"])
        acc = y if acc is None else acc + y
    return _bn_apply(acc, p["bn_out"])


# ----------------------------------- main -----------------------------------

if __name__ == "__main__":
    IN_CH, OUT_CH, KS, PAD, STRIDE = 4, 12, 7, 3, 1   # out_ch = 3 * in_ch (AFA)
    N, H, W = 2, 16, 16

    kg = KeyGen(42)
    x = jax.random.normal(jax.random.PRNGKey(0), (N, IN_CH, H, W), jnp.float32)

    for ver in (True, False):                          # vertical and horizontal
        p = init_repsp1d(kg, IN_CH, OUT_CH, KS, PAD, STRIDE, ver)
        fused = fuse_repsp1d(p)
        fwd = jax.jit(lambda xx, _p=p, _f=fused: repsp1d_attn_dw_forward(_p, _f, xx))
        out = jax.block_until_ready(fwd(x))

        assert out.shape == (N, OUT_CH, H, W), out.shape
        assert bool(jnp.all(jnp.isfinite(out)))

        ref = jax.block_until_ready(repsp1d_reference(p, x))
        assert np.allclose(np.asarray(out), np.asarray(ref),
                           rtol=1e-3, atol=1e-3), \
            float(jnp.max(jnp.abs(out - ref)))

    print("KERNEL_OK")
</pallas_src>

<mosaic_0001>
module attributes {stable_mosaic.version = 11 : i64} {
  func.func @_repsp1d_kernel(%arg0: i32, %arg1: i32, %arg2: memref<1x4x16x16xf32, #tpu.memory_space<vmem>>, %arg3: memref<7x12xf32, #tpu.memory_space<smem>>, %arg4: memref<12xf32, #tpu.memory_space<smem>>, %arg5: memref<1x12x16x16xf32, #tpu.memory_space<vmem>>, %arg6: memref<4x22x16xf32, #tpu.memory_space<vmem>>) attributes {dimension_semantics = [#tpu.dimension_semantics<parallel>, #tpu.dimension_semantics<parallel>], iteration_bounds = array<i64: 2, 1>, scalar_prefetch = 0 : i64, scratch_operands = 1 : i64, tpu.core_type = #tpu.core_type<tc>, window_params = [{transform_indices = @transform_0, window_bounds = array<i64: 1, 4, 16, 16>}, {transform_indices = @transform_1, window_bounds = array<i64: 7, 12>}, {transform_indices = @transform_2, window_bounds = array<i64: 12>}, {transform_indices = @transform_3, window_bounds = array<i64: 1, 12, 16, 16>}]} {
    %cst = arith.constant 0.000000e+00 : f32
    %0 = vector.broadcast %cst : f32 to vector<4x3x16xf32>
    %c0 = arith.constant 0 : index
    %c0_0 = arith.constant 0 : index
    %c0_1 = arith.constant 0 : index
    %1 = vector.load %arg6[%c0, %c0_0, %c0_1] : memref<4x22x16xf32, #tpu.memory_space<vmem>>, vector<4x3x16xf32>
    tpu.vector_store %arg6[%c0, %c0_0, %c0_1], %0 {strides = array<i32>} : memref<4x22x16xf32, #tpu.memory_space<vmem>>, vector<4x3x16xf32>,
    %cst_2 = arith.constant 0.000000e+00 : f32
    %2 = vector.broadcast %cst_2 : f32 to vector<4x3x16xf32>
    %c0_3 = arith.constant 0 : index
    %c19 = arith.constant 19 : index
    %c0_4 = arith.constant 0 : index
    %3 = vector.load %arg6[%c0_3, %c19, %c0_4] : memref<4x22x16xf32, #tpu.memory_space<vmem>>, vector<4x3x16xf32>
    tpu.vector_store %arg6[%c0_3, %c19, %c0_4], %2 {strides = array<i32>} : memref<4x22x16xf32, #tpu.memory_space<vmem>>, vector<4x3x16xf32>,
    %c0_5 = arith.constant 0 : index
    %c0_6 = arith.constant 0 : index
    %c0_7 = arith.constant 0 : index
    %c0_8 = arith.constant 0 : index
    %4 = vector.load %arg2[%c0_5, %c0_6, %c0_7, %c0_8] : memref<1x4x16x16xf32, #tpu.memory_space<vmem>>, vector<1x4x16x16xf32>
    %5 = vector.shape_cast %4 : vector<1x4x16x16xf32> to vector<4x16x16xf32>
    %c0_9 = arith.constant 0 : index
    %c3 = arith.constant 3 : index
    %c0_10 = arith.constant 0 : index
    %6 = vector.load %arg6[%c0_9, %c3, %c0_10] : memref<4x22x16xf32, #tpu.memory_space<vmem>>, vector<4x16x16xf32>
    tpu.vector_store %arg6[%c0_9, %c3, %c0_10], %5 {strides = array<i32>} : memref<4x22x16xf32, #tpu.memory_space<vmem>>, vector<4x16x16xf32>,
    %c0_11 = arith.constant 0 : index
    %7 = memref.load %arg4[%c0_11] : memref<12xf32, #tpu.memory_space<smem>>
    %8 = vector.broadcast %7 : f32 to vector<16x16xf32>
    %c0_12 = arith.constant 0 : index
    %c0_13 = arith.constant 0 : index
    %9 = memref.load %arg3[%c0_12, %c0_13] : memref<7x12xf32, #tpu.memory_space<smem>>
    %c0_14 = arith.constant 0 : index
    %c0_15 = arith.constant 0 : index
    %c0_16 = arith.constant 0 : index
    %10 = vector.load %arg6[%c0_14, %c0_15, %c0_16] : memref<4x22x16xf32, #tpu.memory_space<vmem>>, vector<1x16x16xf32>
    %11 = vector.shape_cast %10 : vector<1x16x16xf32> to vector<16x16xf32>
    %12 = vector.broadcast %9 : f32 to vector<16x16xf32>
    %13 = arith.mulf %12, %11 : vector<16x16xf32>
    %14 = arith.addf %8, %13 : vector<16x16xf32>
    %c1 = arith.constant 1 : index
    %c0_17 = arith.constant 0 : index
    %15 = memref.load %arg3[%c1, %c0_17] : memref<7x12xf32, #tpu.memory_space<smem>>
    %c0_18 = arith.constant 0 : index
    %c1_19 = arith.constant 1 : index
    %c0_20 = arith.constant 0 : index
    %16 = vector.load %arg6[%c0_18, %c1_19, %c0_20] : memref<4x22x16xf32, #tpu.memory_space<vmem>>, vector<1x16x16xf32>
    %17 = vector.shape_cast %16 : vector<1x16x16xf32> to vector<16x16xf32>
    %18 = vector.broadcast %15 : f32 to vector<16x16xf32>
    %19 = arith.mulf %18, %17 : vector<16x16xf32>
    %20 = arith.addf %14, %19 : vector<16x16xf32>
    %c2 = arith.constant 2 : index
    %c0_21 = arith.constant 0 : index
    %21 = memref.load %arg3[%c2, %c0_21] : memref<7x12xf32, #tpu.memory_space<smem>>
    %c0_22 = arith.constant 0 : index
    %c2_23 = arith.constant 2 : index
    %c0_24 = arith.constant 0 : index
    %22 = vector.load %arg6[%c0_22, %c2_23, %c0_24] : memref<4x22x16xf32, #tpu.memory_space<vmem>>, vector<1x16x16xf32>
    %23 = vector.shape_cast %22 : vector<1x16x16xf32> to vector<16x16xf32>
    %24 = vector.broadcast %21 : f32 to vector<16x16xf32>
    %25 = arith.mulf %24, %23 : vector<16x16xf32>
    %26 = arith.addf %20, %25 : vector<16x16xf32>
    %c3_25 = arith.constant 3 : index
    %c0_26 = arith.constant 0 : index
    %27 = memref.load %arg3[%c3_25, %c0_26] : memref<7x12xf32, #tpu.memory_space<smem>>
    %c0_27 = arith.constant 0 : index
    %c3_28 = arith.constant 3 : index
    %c0_29 = arith.constant 0 : index
    %28 = vector.load %arg6[%c0_27, %c3_28, %c0_29] : memref<4x22x16xf32, #tpu.memory_space<vmem>>, vector<1x16x16xf32>
    %29 = vector.shape_cast %28 : vector<1x16x16xf32> to vector<16x16xf32>
    %30 = vector.broadcast %27 : f32 to vector<16x16xf32>
    %31 = arith.mulf %30, %29 : vector<16x16xf32>
    %32 = arith.addf %26, %31 : vector<16x16xf32>
    %c4 = arith.constant 4 : index
    %c0_30 = arith.constant 0 : index
    %33 = memref.load %arg3[%c4, %c0_30] : memref<7x12xf32, #tpu.memory_space<smem>>
    %c0_31 = arith.constant 0 : index
    %c4_32 = arith.constant 4 : index
    %c0_33 = arith.constant 0 : index
    %34 = vector.load %arg6[%c0_31, %c4_32, %c0_33] : memref<4x22x16xf32, #tpu.memory_space<vmem>>, vector<1x16x16xf32>
    %35 = vector.shape_cast %34 : vector<1x16x16xf32> to vector<16x16xf32>
    %36 = vector.broadcast %33 : f32 to vector<16x16xf32>
    %37 = arith.mulf %36, %35 : vector<16x16xf32>
    %38 = arith.addf %32, %37 : vector<16x16xf32>
    %c5 = arith.constant 5 : index
    %c0_34 = arith.constant 0 : index
    %39 = memref.load %arg3[%c5, %c0_34] : memref<7x12xf32, #tpu.memory_space<smem>>
    %c0_35 = arith.constant 0 : index
    %c5_36 = arith.constant 5 : index
    %c0_37 = arith.constant 0 : index
    %40 = vector.load %arg6[%c0_35, %c5_36, %c0_37] : memref<4x22x16xf32, #tpu.memory_space<vmem>>, vector<1x16x16xf32>
    %41 = vector.shape_cast %40 : vector<1x16x16xf32> to vector<16x16xf32>
    %42 = vector.broadcast %39 : f32 to vector<16x16xf32>
    %43 = arith.mulf %42, %41 : vector<16x16xf32>
    %44 = arith.addf %38, %43 : vector<16x16xf32>
    %c6 = arith.constant 6 : index
    %c0_38 = arith.constant 0 : index
    %45 = memref.load %arg3[%c6, %c0_38] : memref<7x12xf32, #tpu.memory_space<smem>>
    %c0_39 = arith.constant 0 : index
    %c6_40 = arith.constant 6 : index
    %c0_41 = arith.constant 0 : index
    %46 = vector.load %arg6[%c0_39, %c6_40, %c0_41] : memref<4x22x16xf32, #tpu.memory_space<vmem>>, vector<1x16x16xf32>
    %47 = vector.shape_cast %46 : vector<1x16x16xf32> to vector<16x16xf32>
    %48 = vector.broadcast %45 : f32 to vector<16x16xf32>
    %49 = arith.mulf %48, %47 : vector<16x16xf32>
    %50 = arith.addf %44, %49 : vector<16x16xf32>
    %c0_42 = arith.constant 0 : index
    %c0_43 = arith.constant 0 : index
    %c0_44 = arith.constant 0 : index
    %c0_45 = arith.constant 0 : index
    %51 = vector.load %arg5[%c0_42, %c0_43, %c0_44, %c0_45] : memref<1x12x16x16xf32, #tpu.memory_space<vmem>>, vector<1x1x16x16xf32>
    %52 = vector.shape_cast %51 : vector<1x1x16x16xf32> to vector<16x16xf32>
    %53 = vector.shape_cast %50 : vector<16x16xf32> to vector<1x1x16x16xf32>
    tpu.vector_store %arg5[%c0_42, %c0_43, %c0_44, %c0_45], %53 {strides = array<i32>} : memref<1x12x16x16xf32, #tpu.memory_space<vmem>>, vector<1x1x16x16xf32>,
    %c1_46 = arith.constant 1 : index
    %54 = memref.load %arg4[%c1_46] : memref<12xf32, #tpu.memory_space<smem>>
    %55 = vector.broadcast %54 : f32 to vector<16x16xf32>
    %c0_47 = arith.constant 0 : index
    %c1_48 = arith.constant 1 : index
    %56 = memref.load %arg3[%c0_47, %c1_48] : memref<7x12xf32, #tpu.memory_space<smem>>
    %c0_49 = arith.constant 0 : index
    %c0_50 = arith.constant 0 : index
    %c0_51 = arith.constant 0 : index
    %57 = vector.load %arg6[%c0_49, %c0_50, %c0_51] : memref<4x22x16xf32, #tpu.memory_space<vmem>>, vector<1x16x16xf32>
    %58 = vector.shape_cast %57 : vector<1x16x16xf32> to vector<16x16xf32>
    %59 = vector.broadcast %56 : f32 to vector<16x16xf32>
    %60 = arith.mulf %59, %58 : vector<16x16xf32>
    %61 = arith.addf %55, %60 : vector<16x16xf32>
    %c1_52 = arith.constant 1 : index
    %c1_53 = arith.constant 1 : index
    %62 = memref.load %arg3[%c1_52, %c1_53] : memref<7x12xf32, #tpu.memory_space<smem>>
    %c0_54 = arith.constant 0 : index
    %c1_55 = arith.constant 1 : index
    %c0_56 = arith.constant 0 : index
    %63 = vector.load %arg6[%c0_54, %c1_55, %c0_56] : memref<4x22x16xf32, #tpu.memory_space<vmem>>, vector<1x16x16xf32>
    %64 = vector.shape_cast %63 : vector<1x16x16xf32> to vector<16x16xf32>
    %65 = vector.broadcast %62 : f32 to vector<16x16xf32>
    %66 = arith.mulf %65, %64 : vector<16x16xf32>
    %67 = arith.addf %61, %66 : vector<16x16xf32>
    %c2_57 = arith.constant 2 : index
    %c1_58 = arith.constant 1 : index
    %68 = memref.load %arg3[%c2_57, %c1_58] : memref<7x12xf32, #tpu.memory_space<smem>>
    %c0_59 = arith.constant 0 : index
    %c2_60 = arith.constant 2 : index
    %c0_61 = arith.constant 0 : index
    %69 = vector.load %arg6[%c0_59, %c2_60, %c0_61] : memref<4x22x16xf32, #tpu.memory_space<vmem>>, vector<1x16x16xf32>
    %70 = vector.shape_cast %69 : vector<1x16x16xf32> to vector<16x16xf32>
    %71 = vector.broadcast %68 : f32 to vector<16x16xf32>
    %72 = arith.mulf %71, %70 : vector<16x16xf32>
    %73 = arith.addf %67, %72 : vector<16x16xf32>
    %c3_62 = arith.constant 3 : index
    %c1_63 = arith.constant 1 : index
    %74 = memref.load %arg3[%c3_62, %c1_63] : memref<7x12xf32, #tpu.memory_space<smem>>
    %c0_64 = arith.constant 0 : index
    %c3_65 = arith.constant 3 : index
    %c0_66 = arith.constant 0 : index
    %75 = vector.load %arg6[%c0_64, %c3_65, %c0_66] : memref<4x22x16xf32, #tpu.memory_space<vmem>>, vector<1x16x16xf32>
    %76 = vector.shape_cast %75 : vector<1x16x16xf32> to vector<16x16xf32>
    %77 = vector.broadcast %74 : f32 to vector<16x16xf32>
    %78 = arith.mulf %77, %76 : vector<16x16xf32>
    %79 = arith.addf %73, %78 : vector<16x16xf32>
    %c4_67 = arith.constant 4 : index
    %c1_68 = arith.constant 1 : index
    %80 = memref.load %arg3[%c4_67, %c1_68] : memref<7x12xf32, #tpu.memory_space<smem>>
    %c0_69 = arith.constant 0 : index
    %c4_70 = arith.constant 4 : index
    %c0_71 = arith.constant 0 : index
    %81 = vector.load %arg6[%c0_69, %c4_70, %c0_71] : memref<4x22x16xf32, #tpu.memory_space<vmem>>, vector<1x16x16xf32>
    %82 = vector.shape_cast %81 : vector<1x16x16xf32> to vector<16x16xf32>
    %83 = vector.broadcast %80 : f32 to vector<16x16xf32>
    %84 = arith.mulf %83, %82 : vector<16x16xf32>
    %85 = arith.addf %79, %84 : vector<16x16xf32>
    %c5_72 = arith.constant 5 : index
    %c1_73 = arith.constant 1 : index
    %86 = memref.load %arg3[%c5_72, %c1_73] : memref<7x12xf32, #tpu.memory_space<smem>>
    %c0_74 = arith.constant 0 : index
    %c5_75 = arith.constant 5 : index
    %c0_76 = arith.constant 0 : index
    %87 = vector.load %arg6[%c0_74, %c5_75, %c0_76] : memref<4x22x16xf32, #tpu.memory_space<vmem>>, vector<1x16x16xf32>
    %88 = vector.shape_cast %87 : vector<1x16x16xf32> to vector<16x16xf32>
    %89 = vector.broadcast %86 : f32 to vector<16x16xf32>
    %90 = arith.mulf %89, %88 : vector<16x16xf32>
    %91 = arith.addf %85, %90 : vector<16x16xf32>
    %c6_77 = arith.constant 6 : index
    %c1_78 = arith.constant 1 : index
    %92 = memref.load %arg3[%c6_77, %c1_78] : memref<7x12xf32, #tpu.memory_space<smem>>
    %c0_79 = arith.constant 0 : index
    %c6_80 = arith.constant 6 : index
    %c0_81 = arith.constant 0 : index
    %93 = vector.load %arg6[%c0_79, %c6_80, %c0_81] : memref<4x22x16xf32, #tpu.memory_space<vmem>>, vector<1x16x16xf32>
    %94 = vector.shape_cast %93 : vector<1x16x16xf32> to vector<16x16xf32>
    %95 = vector.broadcast %92 : f32 to vector<16x16xf32>
    %96 = arith.mulf %95, %94 : vector<16x16xf32>
    %97 = arith.addf %91, %96 : vector<16x16xf32>
    %c0_82 = arith.constant 0 : index
    %c1_83 = arith.constant 1 : index
    %c0_84 = arith.constant 0 : index
    %c0_85 = arith.constant 0 : index
    %98 = vector.load %arg5[%c0_82, %c1_83, %c0_84, %c0_85] : memref<1x12x16x16xf32, #tpu.memory_space<vmem>>, vector<1x1x16x16xf32>
    %99 = vector.shape_cast %98 : vector<1x1x16x16xf32> to vector<16x16xf32>
    %100 = vector.shape_cast %97 : vector<16x16xf32> to vector<1x1x16x16xf32>
    tpu.vector_store %arg5[%c0_82, %c1_83, %c0_84, %c0_85], %100 {strides = array<i32>} : memref<1x12x16x16xf32, #tpu.memory_space<vmem>>, vector<1x1x16x16xf32>,
    %c2_86 = arith.constant 2 : index
    %101 = memref.load %arg4[%c2_86] : memref<12xf32, #tpu.memory_space<smem>>
    %102 = vector.broadcast %101 : f32 to vector<16x16xf32>
    %c0_87 = arith.constant 0 : index
    %c2_88 = arith.constant 2 : index
    %103 = memref.load %arg3[%c0_87, %c2_88] : memref<7x12xf32, #tpu.memory_space<smem>>
    %c0_89 = arith.constant 0 : index
    %c0_90 = arith.constant 0 : index
    %c0_91 = arith.constant 0 : index
    %104 = vector.load %arg6[%c0_89, %c0_90, %c0_91] : memref<4x22x16xf32, #tpu.memory_space<vmem>>, vector<1x16x16xf32>
    %105 = vector.shape_cast %104 : vector<1x16x16xf32> to vector<16x16xf32>
    %106 = vector.broadcast %103 : f32 to vector<16x16xf32>
    %107 = arith.mulf %106, %105 : vector<16x16xf32>
    %108 = arith.addf %102, %107 : vector<16x16xf32>
    %c1_92 = arith.constant 1 : index
    %c2_93 = arith.constant 2 : index
    %109 = memref.load %arg3[%c1_92, %c2_93] : memref<7x12xf32, #tpu.memory_space<smem>>
    %c0_94 = arith.constant 0 : index
    %c1_95 = arith.constant 1 : index
    %c0_96 = arith.constant 0 : index
    %110 = vector.load %arg6[%c0_94, %c1_95, %c0_96] : memref<4x22x16xf32, #tpu.memory_space<vmem>>, vector<1x16x16xf32>
    %111 = vector.shape_cast %110 : vector<1x16x16xf32> to vector<16x16xf32>
    %112 = vector.broadcast %109 : f32 to vector<16x16xf32>
    %113 = arith.mulf %112, %111 : vector<16x16xf32>
    %114 = arith.addf %108, %113 : vector<16x16xf32>
    %c2_97 = arith.constant 2 : index
    %c2_98 = arith.constant 2 : index
    %115 = memref.load %arg3[%c2_97, %c2_98] : memref<7x12xf32, #tpu.memory_space<smem>>
    %c0_99 = arith.constant 0 : index
    %c2_100 = arith.constant 2 : index
    %c0_101 = arith.constant 0 : index
    %116 = vector.load %arg6[%c0_99, %c2_100, %c0_101] : memref<4x22x16xf32, #tpu.memory_space<vmem>>, vector<1x16x16xf32>
    %117 = vector.shape_cast %116 : vector<1x16x16xf32> to vector<16x16xf32>
    %118 = vector.broadcast %115 : f32 to vector<16x16xf32>
    %119 = arith.mulf %118, %117 : vector<16x16xf32>
    %120 = arith.addf %114, %119 : vector<16x16xf32>
    %c3_102 = arith.constant 3 : index
    %c2_103 = arith.constant 2 : index
    %121 = memref.load %arg3[%c3_102, %c2_103] : memref<7x12xf32, #tpu.memory_space<smem>>
    %c0_104 = arith.constant 0 : index
    %c3_105 = arith.constant 3 : index
    %c0_106 = arith.constant 0 : index
    %122 = vector.load %arg6[%c0_104, %c3_105, %c0_106] : memref<4x22x16xf32, #tpu.memory_space<vmem>>, vector<1x16x16xf32>
    %123 = vector.shape_cast %122 : vector<1x16x16xf32> to vector<16x16xf32>
    %124 = vector.broadcast %121 : f32 to vector<16x16xf32>
    %125 = arith.mulf %124, %123 : vector<16x16xf32>
    %126 = arith.addf %120, %125 : vector<16x16xf32>
    %c4_107 = arith.constant 4 : index
    %c2_108 = arith.constant 2 : index
    %127 = memref.load %arg3[%c4_107, %c2_108] : memref<7x12xf32, #tpu.memory_space<smem>>
    %c0_109 = arith.constant 0 : index
    %c4_110 = arith.constant 4 : index
    %c0_111 = arith.constant 0 : index
    %128 = vector.load %arg6[%c0_109, %c4_110, %c0_111] : memref<4x22x16xf32, #tpu.memory_space<vmem>>, vector<1x16x16xf32>
    %129 = vector.shape_cast %128 : vector<1x16x16xf32> to vector<16x16xf32>
    %130 = vector.broadcast %127 : f32 to vector<16x16xf32>
    %131 = arith.mulf %130, %129 : vector<16x16xf32>
    %132 = arith.addf %126, %131 : vector<16x16xf32>
    %c5_112 = arith.constant 5 : index
    %c2_113 = arith.constant 2 : index
    %133 = memref.load %arg3[%c5_112, %c2_113] : memref<7x12xf32, #tpu.memory_space<smem>>
    %c0_114 = arith.constant 0 : index
    %c5_115 = arith.constant 5 : index
    %c0_116 = arith.constant 0 : index
    %134 = vector.load %arg6[%c0_114, %c5_115, %c0_116] : memref<4x22x16xf32, #tpu.memory_space<vmem>>, vector<1x16x16xf32>
    %135 = vector.shape_cast %134 : vector<1x16x16xf32> to vector<16x16xf32>
    %136 = vector.broadcast %133 : f32 to vector<16x16xf32>
    %137 = arith.mulf %136, %135 : vector<16x16xf32>
    %138 = arith.addf %132, %137 : vector<16x16xf32>
    %c6_117 = arith.constant 6 : index
    %c2_118 = arith.constant 2 : index
    %139 = memref.load %arg3[%c6_117, %c2_118] : memref<7x12xf32, #tpu.memory_space<smem>>
    %c0_119 = arith.constant 0 : index
    %c6_120 = arith.constant 6 : index
    %c0_121 = arith.constant 0 : index
    %140 = vector.load %arg6[%c0_119, %c6_120, %c0_121] : memref<4x22x16xf32, #tpu.memory_space<vmem>>, vector<1x16x16xf32>
    %141 = vector.shape_cast %140 : vector<1x16x16xf32> to vector<16x16xf32>
    %142 = vector.broadcast %139 : f32 to vector<16x16xf32>
    %143 = arith.mulf %142, %141 : vector<16x16xf32>
    %144 = arith.addf %138, %143 : vector<16x16xf32>
    %c0_122 = arith.constant 0 : index
    %c2_123 = arith.constant 2 : index
    %c0_124 = arith.constant 0 : index
    %c0_125 = arith.constant 0 : index
    %145 = vector.load %arg5[%c0_122, %c2_123, %c0_124, %c0_125] : memref<1x12x16x16xf32, #tpu.memory_space<vmem>>, vector<1x1x16x16xf32>
    %146 = vector.shape_cast %145 : vector<1x1x16x16xf32> to vector<16x16xf32>
    %147 = vector.shape_cast %144 : vector<16x16xf32> to vector<1x1x16x16xf32>
    tpu.vector_store %arg5[%c0_122, %c2_123, %c0_124, %c0_125], %147 {strides = array<i32>} : memref<1x12x16x16xf32, #tpu.memory_space<vmem>>, vector<1x1x16x16xf32>,
    %c3_126 = arith.constant 3 : index
    %148 = memref.load %arg4[%c3_126] : memref<12xf32, #tpu.memory_space<smem>>
    %149 = vector.broadcast %148 : f32 to vector<16x16xf32>
    %c0_127 = arith.constant 0 : index
    %c3_128 = arith.constant 3 : index
    %150 = memref.load %arg3[%c0_127, %c3_128] : memref<7x12xf32, #tpu.memory_space<smem>>
    %c1_129 = arith.constant 1 : index
    %c0_130 = arith.constant 0 : index
    %c0_131 = arith.constant 0 : index
    %151 = vector.load %arg6[%c1_129, %c0_130, %c0_131] : memref<4x22x16xf32, #tpu.memory_space<vmem>>, vector<1x16x16xf32>
    %152 = vector.shape_cast %151 : vector<1x16x16xf32> to vector<16x16xf32>
    %153 = vector.broadcast %150 : f32 to vector<16x16xf32>
    %154 = arith.mulf %153, %152 : vector<16x16xf32>
    %155 = arith.addf %149, %154 : vector<16x16xf32>
    %c1_132 = arith.constant 1 : index
    %c3_133 = arith.constant 3 : index
    %156 = memref.load %arg3[%c1_132, %c3_133] : memref<7x12xf32, #tpu.memory_space<smem>>
    %c1_134 = arith.constant 1 : index
    %c1_135 = arith.constant 1 : index
    %c0_136 = arith.constant 0 : index
    %157 = vector.load %arg6[%c1_134, %c1_135, %c0_136] : memref<4x22x16xf32, #tpu.memory_space<vmem>>, vector<1x16x16xf32>
    %158 = vector.shape_cast %157 : vector<1x16x16xf32> to vector<16x16xf32>
    %159 = vector.broadcast %156 : f32 to vector<16x16xf32>
    %160 = arith.mulf %159, %158 : vector<16x16xf32>
    %161 = arith.addf %155, %160 : vector<16x16xf32>
    %c2_137 = arith.constant 2 : index
    %c3_138 = arith.constant 3 : index
    %162 = memref.load %arg3[%c2_137, %c3_138] : memref<7x12xf32, #tpu.memory_space<smem>>
    %c1_139 = arith.constant 1 : index
    %c2_140 = arith.constant 2 : index
    %c0_141 = arith.constant 0 : index
    %163 = vector.load %arg6[%c1_139, %c2_140, %c0_141] : memref<4x22x16xf32, #tpu.memory_space<vmem>>, vector<1x16x16xf32>
    %164 = vector.shape_cast %163 : vector<1x16x16xf32> to vector<16x16xf32>
    %165 = vector.broadcast %162 : f32 to vector<16x16xf32>
    %166 = arith.mulf %165, %164 : vector<16x16xf32>
    %167 = arith.addf %161, %166 : vector<16x16xf32>
    %c3_142 = arith.constant 3 : index
    %c3_143 = arith.constant 3 : index
    %168 = memref.load %arg3[%c3_142, %c3_143] : memref<7x12xf32, #tpu.memory_space<smem>>
    %c1_144 = arith.constant 1 : index
    %c3_145 = arith.constant 3 : index
    %c0_146 = arith.constant 0 : index
    %169 = vector.load %arg6[%c1_144, %c3_145, %c0_146] : memref<4x22x16xf32, #tpu.memory_space<vmem>>, vector<1x16x16xf32>
    %170 = vector.shape_cast %169 : vector<1x16x16xf32> to vector<16x16xf32>
    %171 = vector.broadcast %168 : f32 to vector<16x16xf32>
    %172 = arith.mulf %171, %170 : vector<16x16xf32>
    %173 = arith.addf %167, %172 : vector<16x16xf32>
    %c4_147 = arith.constant 4 : index
    %c3_148 = arith.constant 3 : index
    %174 = memref.load %arg3[%c4_147, %c3_148] : memref<7x12xf32, #tpu.memory_space<smem>>
    %c1_149 = arith.constant 1 : index
    %c4_150 = arith.constant 4 : index
    %c0_151 = arith.constant 0 : index
    %175 = vector.load %arg6[%c1_149, %c4_150, %c0_151] : memref<4x22x16xf32, #tpu.memory_space<vmem>>, vector<1x16x16xf32>
    %176 = vector.shape_cast %175 : vector<1x16x16xf32> to vector<16x16xf32>
    %177 = vector.broadcast %174 : f32 to vector<16x16xf32>
    %178 = arith.mulf %177, %176 : vector<16x16xf32>
    %179 = arith.addf %173, %178 : vector<16x16xf32>
    %c5_152 = arith.constant 5 : index
    %c3_153 = arith.constant 3 : index
    %180 = memref.load %arg3[%c5_152, %c3_153] : memref<7x12xf32, #tpu.memory_space<smem>>
    %c1_154 = arith.constant 1 : index
    %c5_155 = arith.constant 5 : index
    %c0_156 = arith.constant 0 : index
    %181 = vector.load %arg6[%c1_154, %c5_155, %c0_156] : memref<4x22x16xf32, #tpu.memory_space<vmem>>, vector<1x16x16xf32>
    %182 = vector.shape_cast %181 : vector<1x16x16xf32> to vector<16x16xf32>
    %183 = vector.broadcast %180 : f32 to vector<16x16xf32>
    %184 = arith.mulf %183, %182 : vector<16x16xf32>
    %185 = arith.addf %179, %184 : vector<16x16xf32>
    %c6_157 = arith.constant 6 : index
    %c3_158 = arith.constant 3 : index
    %186 = memref.load %arg3[%c6_157, %c3_158] : memref<7x12xf32, #tpu.memory_space<smem>>
    %c1_159 = arith.constant 1 : index
    %c6_160 = arith.constant 6 : index
    %c0_161 = arith.constant 0 : index
    %187 = vector.load %arg6[%c1_159, %c6_160, %c0_161] : memref<4x22x16xf32, #tpu.memory_space<vmem>>, vector<1x16x16xf32>
    %188 = vector.shape_cast %187 : vector<1x16x16xf32> to vector<16x16xf32>
    %189 = vector.broadcast %186 : f32 to vector<16x16xf32>
    %190 = arith.mulf %189, %188 : vector<16x16xf32>
    %191 = arith.addf %185, %190 : vector<16x16xf32>
    %c0_162 = arith.constant 0 : index
    %c3_163 = arith.constant 3 : index
    %c0_164 = arith.constant 0 : index
    %c0_165 = arith.constant 0 : index
    %192 = vector.load %arg5[%c0_162, %c3_163, %c0_164, %c0_165] : memref<1x12x16x16xf32, #tpu.memory_space<vmem>>, vector<1x1x16x16xf32>
    %193 = vector.shape_cast %192 : vector<1x1x16x16xf32> to vector<16x16xf32>
    %194 = vector.shape_cast %191 : vector<16x16xf32> to vector<1x1x16x16xf32>
    tpu.vector_store %arg5[%c0_162, %c3_163, %c0_164, %c0_165], %194 {strides = array<i32>} : memref<1x12x16x16xf32, #tpu.memory_space<vmem>>, vector<1x1x16x16xf32>,
    %c4_166 = arith.constant 4 : index
    %195 = memref.load %arg4[%c4_166] : memref<12xf32, #tpu.memory_space<smem>>
    %196 = vector.broadcast %195 : f32 to vector<16x16xf32>
    %c0_167 = arith.constant 0 : index
    %c4_168 = arith.constant 4 : index
    %197 = memref.load %arg3[%c0_167, %c4_168] : memref<7x12xf32, #tpu.memory_space<smem>>
    %c1_169 = arith.constant 1 : index
    %c0_170 = arith.constant 0 : index
    %c0_171 = arith.constant 0 : index
    %198 = vector.load %arg6[%c1_169, %c0_170, %c0_171] : memref<4x22x16xf32, #tpu.memory_space<vmem>>, vector<1x16x16xf32>
    %199 = vector.shape_cast %198 : vector<1x16x16xf32> to vector<16x16xf32>
    %200 = vector.broadcast %197 : f32 to vector<16x16xf32>
    %201 = arith.mulf %200, %199 : vector<16x16xf32>
    %202 = arith.addf %196, %201 : vector<16x16xf32>
    %c1_172 = arith.constant 1 : index
    %c4_173 = arith.constant 4 : index
    %203 = memref.load %arg3[%c1_172, %c4_173] : memref<7x12xf32, #tpu.memory_space<smem>>
    %c1_174 = arith.constant 1 : index
    %c1_175 = arith.constant 1 : index
    %c0_176 = arith.constant 0 : index
    %204 = vector.load %arg6[%c1_174, %c1_175, %c0_176] : memref<4x22x16xf32, #tpu.memory_space<vmem>>, vector<1x16x16xf32>
    %205 = vector.shape_cast %204 : vector<1x16x16xf32> to vector<16x16xf32>
    %206 = vector.broadcast %203 : f32 to vector<16x16xf32>
    %207 = arith.mulf %206, %205 : vector<16x16xf32>
    %208 = arith.addf %202, %207 : vector<16x16xf32>
    %c2_177 = arith.constant 2 : index
    %c4_178 = arith.constant 4 : index
    %209 = memref.load %arg3[%c2_177, %c4_178] : memref<7x12xf32, #tpu.memory_space<smem>>
    %c1_179 = arith.constant 1 : index
    %c2_180 = arith.constant 2 : index
    %c0_181 = arith.constant 0 : index
    %210 = vector.load %arg6[%c1_179, %c2_180, %c0_181] : memref<4x22x16xf32, #tpu.memory_space<vmem>>, vector<1x16x16xf32>
    %211 = vector.shape_cast %210 : vector<1x16x16xf32> to vector<16x16xf32>
    %212 = vector.broadcast %209 : f32 to vector<16x16xf32>
    %213 = arith.mulf %212, %211 : vector<16x16xf32>
    %214 = arith.addf %208, %213 : vector<16x16xf32>
    %c3_182 = arith.constant 3 : index
    %c4_183 = arith.constant 4 : index
    %215 = memref.load %arg3[%c3_182, %c4_183] : memref<7x12xf32, #tpu.memory_space<smem>>
    %c1_184 = arith.constant 1 : index
    %c3_185 = arith.constant 3 : index
    %c0_186 = arith.constant 0 : index
    %216 = vector.load %arg6[%c1_184, %c3_185, %c0_186] : memref<4x22x16xf32, #tpu.memory_space<vmem>>, vector<1x16x16xf32>
    %217 = vector.shape_cast %216 : vector<1x16x16xf32> to vector<16x16xf32>
    %218 = vector.broadcast %215 : f32 to vector<16x16xf32>
    %219 = arith.mulf %218, %217 : vector<16x16xf32>
    %220 = arith.addf %214, %219 : vector<16x16xf32>
    %c4_187 = arith.constant 4 : index
    %c4_188 = arith.constant 4 : index
    %221 = memref.load %arg3[%c4_187, %c4_188] : memref<7x12xf32, #tpu.memory_space<smem>>
    %c1_189 = arith.constant 1 : index
    %c4_190 = arith.constant 4 : index
    %c0_191 = arith.constant 0 : index
    %222 = vector.load %arg6[%c1_189, %c4_190, %c0_191] : memref<4x22x16xf32, #tpu.memory_space<vmem>>, vector<1x16x16xf32>
    %223 = vector.shape_cast %222 : vector<1x16x16xf32> to vector<16x16xf32>
    %224 = vector.broadcast %221 : f32 to vector<16x16xf32>
    %225 = arith.mulf %224, %223 : vector<16x16xf32>
    %226 = arith.addf %220, %225 : vector<16x16xf32>
    %c5_192 = arith.constant 5 : index
    %c4_193 = arith.constant 4 : index
    %227 = memref.load %arg3[%c5_192, %c4_193] : memref<7x12xf32, #tpu.memory_space<smem>>
    %c1_194 = arith.constant 1 : index
    %c5_195 = arith.constant 5 : index
    %c0_196 = arith.constant 0 : index
    %228 = vector.load %arg6[%c1_194, %c5_195, %c0_196] : memref<4x22x16xf32, #tpu.memory_space<vmem>>, vector<1x16x16xf32>
    %229 = vector.shape_cast %228 : vector<1x16x16xf32> to vector<16x16xf32>
    %230 = vector.broadcast %227 : f32 to vector<16x16xf32>
    %231 = arith.mulf %230, %229 : vector<16x16xf32>
    %232 = arith.addf %226, %231 : vector<16x16xf32>
    %c6_197 = arith.constant 6 : index
    %c4_198 = arith.constant 4 : index
    %233 = memref.load %arg3[%c6_197, %c4_198] : memref<7x12xf32, #tpu.memory_space<smem>>
    %c1_199 = arith.constant 1 : index
    %c6_200 = arith.constant 6 : index
    %c0_201 = arith.constant 0 : index
    %234 = vector.load %arg6[%c1_199, %c6_200, %c0_201] : memref<4x22x16xf32, #tpu.memory_space<vmem>>, vector<1x16x16xf32>
    %235 = vector.shape_cast %234 : vector<1x16x16xf32> to vector<16x16xf32>
    %236 = vector.broadcast %233 : f32 to vector<16x16xf32>
    %237 = arith.mulf %236, %235 : vector<16x16xf32>
    %238 = arith.addf %232, %237 : vector<16x16xf32>
    %c0_202 = arith.constant 0 : index
    %c4_203 = arith.constant 4 : index
    %c0_204 = arith.constant 0 : index
    %c0_205 = arith.constant 0 : index
    %239 = vector.load %arg5[%c0_202, %c4_203, %c0_204, %c0_205] : memref<1x12x16x16xf32, #tpu.memory_space<vmem>>, vector<1x1x16x16xf32>
    %240 = vector.shape_cast %239 : vector<1x1x16x16xf32> to vector<16x16xf32>
    %241 = vector.shape_cast %238 : vector<16x16xf32> to vector<1x1x16x16xf32>
    tpu.vector_store %arg5[%c0_202, %c4_203, %c0_204, %c0_205], %241 {strides = array<i32>} : memref<1x12x16x16xf32, #tpu.memory_space<vmem>>, vector<1x1x16x16xf32>,
    %c5_206 = arith.constant 5 : index
    %242 = memref.load %arg4[%c5_206] : memref<12xf32, #tpu.memory_space<smem>>
    %243 = vector.broadcast %242 : f32 to vector<16x16xf32>
    %c0_207 = arith.constant 0 : index
    %c5_208 = arith.constant 5 : index
    %244 = memref.load %arg3[%c0_207, %c5_208] : memref<7x12xf32, #tpu.memory_space<smem>>
    %c1_209 = arith.constant 1 : index
    %c0_210 = arith.constant 0 : index
    %c0_211 = arith.constant 0 : index
    %245 = vector.load %arg6[%c1_209, %c0_210, %c0_211] : memref<4x22x16xf32, #tpu.memory_space<vmem>>, vector<1x16x16xf32>
    %246 = vector.shape_cast %245 : vector<1x16x16xf32> to vector<16x16xf32>
    %247 = vector.broadcast %244 : f32 to vector<16x16xf32>
    %248 = arith.mulf %247, %246 : vector<16x16xf32>
    %249 = arith.addf %243, %248 : vector<16x16xf32>
    %c1_212 = arith.constant 1 : index
    %c5_213 = arith.constant 5 : index
    %250 = memref.load %arg3[%c1_212, %c5_213] : memref<7x12xf32, #tpu.memory_space<smem>>
    %c1_214 = arith.constant 1 : index
    %c1_215 = arith.constant 1 : index
    %c0_216 = arith.constant 0 : index
    %251 = vector.load %arg6[%c1_214, %c1_215, %c0_216] : memref<4x22x16xf32, #tpu.memory_space<vmem>>, vector<1x16x16xf32>
    %252 = vector.shape_cast %251 : vector<1x16x16xf32> to vector<16x16xf32>
    %253 = vector.broadcast %250 : f32 to vector<16x16xf32>
    %254 = arith.mulf %253, %252 : vector<16x16xf32>
    %255 = arith.addf %249, %254 : vector<16x16xf32>
    %c2_217 = arith.constant 2 : index
    %c5_218 = arith.constant 5 : index
    %256 = memref.load %arg3[%c2_217, %c5_218] : memref<7x12xf32, #tpu.memory_space<smem>>
    %c1_219 = arith.constant 1 : index
    %c2_220 = arith.constant 2 : index
    %c0_221 = arith.constant 0 : index
    %257 = vector.load %arg6[%c1_219, %c2_220, %c0_221] : memref<4x22x16xf32, #tpu.memory_space<vmem>>, vector<1x16x16xf32>
    %258 = vector.shape_cast %257 : vector<1x16x16xf32> to vector<16x16xf32>
    %259 = vector.broadcast %256 : f32 to vector<16x16xf32>
    %260 = arith.mulf %259, %258 : vector<16x16xf32>
    %261 = arith.addf %255, %260 : vector<16x16xf32>
    %c3_222 = arith.constant 3 : index
    %c5_223 = arith.constant 5 : index
    %262 = memref.load %arg3[%c3_222, %c5_223] : memref<7x12xf32, #tpu.memory_space<smem>>
    %c1_224 = arith.constant 1 : index
    %c3_225 = arith.constant 3 : index
    %c0_226 = arith.constant 0 : index
    %263 = vector.load %arg6[%c1_224, %c3_225, %c0_226] : memref<4x22x16xf32, #tpu.memory_space<vmem>>, vector<1x16x16xf32>
    %264 = vector.shape_cast %263 : vector<1x16x16xf32> to vector<16x16xf32>
    %265 = vector.broadcast %262 : f32 to vector<16x16xf32>
    %266 = arith.mulf %265, %264 : vector<16x16xf32>
    %267 = arith.addf %261, %266 : vector<16x16xf32>
    %c4_227 = arith.constant 4 : index
    %c5_228 = arith.constant 5 : index
    %268 = memref.load %arg3[%c4_227, %c5_228] : memref<7x12xf32, #tpu.memory_space<smem>>
    %c1_229 = arith.constant 1 : index
    %c4_230 = arith.constant 4 : index
    %c0_231 = arith.constant 0 : index
    %269 = vector.load %arg6[%c1_229, %c4_230, %c0_231] : memref<4x22x16xf32, #tpu.memory_space<vmem>>, vector<1x16x16xf32>
    %270 = vector.shape_cast %269 : vector<1x16x16xf32> to vector<16x16xf32>
    %271 = vector.broadcast %268 : f32 to vector<16x16xf32>
    %272 = arith.mulf %271, %270 : vector<16x16xf32>
    %273 = arith.addf %267, %272 : vector<16x16xf32>
    %c5_232 = arith.constant 5 : index
    %c5_233 = arith.constant 5 : index
    %274 = memref.load %arg3[%c5_232, %c5_233] : memref<7x12xf32, #tpu.memory_space<smem>>
    %c1_234 = arith.constant 1 : index
    %c5_235 = arith.constant 5 : index
    %c0_236 = arith.constant 0 : index
    %275 = vector.load %arg6[%c1_234, %c5_235, %c0_236] : memref<4x22x16xf32, #tpu.memory_space<vmem>>, vector<1x16x16xf32>
    %276 = vector.shape_cast %275 : vector<1x16x16xf32> to vector<16x16xf32>
    %277 = vector.broadcast %274 : f32 to vector<16x16xf32>
    %278 = arith.mulf %277, %276 : vector<16x16xf32>
    %279 = arith.addf %273, %278 : vector<16x16xf32>
    %c6_237 = arith.constant 6 : index
    %c5_238 = arith.constant 5 : index
    %280 = memref.load %arg3[%c6_237, %c5_238] : memref<7x12xf32, #tpu.memory_space<smem>>
    %c1_239 = arith.constant 1 : index
    %c6_240 = arith.constant 6 : index
    %c0_241 = arith.constant 0 : index
    %281 = vector.load %arg6[%c1_239, %c6_240, %c0_241] : memref<4x22x16xf32, #tpu.memory_space<vmem>>, vector<1x16x16xf32>
    %282 = vector.shape_cast %281 : vector<1x16x16xf32> to vector<16x16xf32>
    %283 = vector.broadcast %280 : f32 to vector<16x16xf32>
    %284 = arith.mulf %283, %282 : vector<16x16xf32>
    %285 = arith.addf %279, %284 : vector<16x16xf32>
    %c0_242 = arith.constant 0 : index
    %c5_243 = arith.constant 5 : index
    %c0_244 = arith.constant 0 : index
    %c0_245 = arith.constant 0 : index
    %286 = vector.load %arg5[%c0_242, %c5_243, %c0_244, %c0_245] : memref<1x12x16x16xf32, #tpu.memory_space<vmem>>, vector<1x1x16x16xf32>
    %287 = vector.shape_cast %286 : vector<1x1x16x16xf32> to vector<16x16xf32>
    %288 = vector.shape_cast %285 : vector<16x16xf32> to vector<1x1x16x16xf32>
    tpu.vector_store %arg5[%c0_242, %c5_243, %c0_244, %c0_245], %288 {strides = array<i32>} : memref<1x12x16x16xf32, #tpu.memory_space<vmem>>, vector<1x1x16x16xf32>,
    %c6_246 = arith.constant 6 : index
    %289 = memref.load %arg4[%c6_246] : memref<12xf32, #tpu.memory_space<smem>>
    %290 = vector.broadcast %289 : f32 to vector<16x16xf32>
    %c0_247 = arith.constant 0 : index
    %c6_248 = arith.constant 6 : index
    %291 = memref.load %arg3[%c0_247, %c6_248] : memref<7x12xf32, #tpu.memory_space<smem>>
    %c2_249 = arith.constant 2 : index
    %c0_250 = arith.constant 0 : index
    %c0_251 = arith.constant 0 : index
    %292 = vector.load %arg6[%c2_249, %c0_250, %c0_251] : memref<4x22x16xf32, #tpu.memory_space<vmem>>, vector<1x16x16xf32>
    %293 = vector.shape_cast %292 : vector<1x16x16xf32> to vector<16x16xf32>
    %294 = vector.broadcast %291 : f32 to vector<16x16xf32>
    %295 = arith.mulf %294, %293 : vector<16x16xf32>
    %296 = arith.addf %290, %295 : vector<16x16xf32>
    %c1_252 = arith.constant 1 : index
    %c6_253 = arith.constant 6 : index
    %297 = memref.load %arg3[%c1_252, %c6_253] : memref<7x12xf32, #tpu.memory_space<smem>>
    %c2_254 = arith.constant 2 : index
    %c1_255 = arith.constant 1 : index
    %c0_256 = arith.constant 0 : index
    %298 = vector.load %arg6[%c2_254, %c1_255, %c0_256] : memref<4x22x16xf32, #tpu.memory_space<vmem>>, vector<1x16x16xf32>
    %299 = vector.shape_cast %298 : vector<1x16x16xf32> to vector<16x16xf32>
    %300 = vector.broadcast %297 : f32 to vector<16x16xf32>
    %301 = arith.mulf %300, %299 : vector<16x16xf32>
    %302 = arith.addf %296, %301 : vector<16x16xf32>
    %c2_257 = arith.constant 2 : index
    %c6_258 = arith.constant 6 : index
    %303 = memref.load %arg3[%c2_257, %c6_258] : memref<7x12xf32, #tpu.memory_space<smem>>
    %c2_259 = arith.constant 2 : index
    %c2_260 = arith.constant 2 : index
    %c0_261 = arith.constant 0 : index
    %304 = vector.load %arg6[%c2_259, %c2_260, %c0_261] : memref<4x22x16xf32, #tpu.memory_space<vmem>>, vector<1x16x16xf32>
    %305 = vector.shape_cast %304 : vector<1x16x16xf32> to vector<16x16xf32>
    %306 = vector.broadcast %303 : f32 to vector<16x16xf32>
    %307 = arith.mulf %306, %305 : vector<16x16xf32>
    %308 = arith.addf %302, %307 : vector<16x16xf32>
    %c3_262 = arith.constant 3 : index
    %c6_263 = arith.constant 6 : index
    %309 = memref.load %arg3[%c3_262, %c6_263] : memref<7x12xf32, #tpu.memory_space<smem>>
    %c2_264 = arith.constant 2 : index
    %c3_265 = arith.constant 3 : index
    %c0_266 = arith.constant 0 : index
    %310 = vector.load %arg6[%c2_264, %c3_265, %c0_266] : memref<4x22x16xf32, #tpu.memory_space<vmem>>, vector<1x16x16xf32>
    %311 = vector.shape_cast %310 : vector<1x16x16xf32> to vector<16x16xf32>
    %312 = vector.broadcast %309 : f32 to vector<16x16xf32>
    %313 = arith.mulf %312, %311 : vector<16x16xf32>
    %314 = arith.addf %308, %313 : vector<16x16xf32>
    %c4_267 = arith.constant 4 : index
    %c6_268 = arith.constant 6 : index
    %315 = memref.load %arg3[%c4_267, %c6_268] : memref<7x12xf32, #tpu.memory_space<smem>>
    %c2_269 = arith.constant 2 : index
    %c4_270 = arith.constant 4 : index
    %c0_271 = arith.constant 0 : index
    %316 = vector.load %arg6[%c2_269, %c4_270, %c0_271] : memref<4x22x16xf32, #tpu.memory_space<vmem>>, vector<1x16x16xf32>
    %317 = vector.shape_cast %316 : vector<1x16x16xf32> to vector<16x16xf32>
    %318 = vector.broadcast %315 : f32 to vector<16x16xf32>
    %319 = arith.mulf %318, %317 : vector<16x16xf32>
    %320 = arith.addf %314, %319 : vector<16x16xf32>
    %c5_272 = arith.constant 5 : index
    %c6_273 = arith.constant 6 : index
    %321 = memref.load %arg3[%c5_272, %c6_273] : memref<7x12xf32, #tpu.memory_space<smem>>
    %c2_274 = arith.constant 2 : index
    %c5_275 = arith.constant 5 : index
    %c0_276 = arith.constant 0 : index
    %322 = vector.load %arg6[%c2_274, %c5_275, %c0_276] : memref<4x22x16xf32, #tpu.memory_space<vmem>>, vector<1x16x16xf32>
    %323 = vector.shape_cast %322 : vector<1x16x16xf32> to vector<16x16xf32>
    %324 = vector.broadcast %321 : f32 to vector<16x16xf32>
    %325 = arith.mulf %324, %323 : vector<16x16xf32>
    %326 = arith.addf %320, %325 : vector<16x16xf32>
    %c6_277 = arith.constant 6 : index
    %c6_278 = arith.constant 6 : index
    %327 = memref.load %arg3[%c6_277, %c6_278] : memref<7x12xf32, #tpu.memory_space<smem>>
    %c2_279 = arith.constant 2 : index
    %c6_280 = arith.constant 6 : index
    %c0_281 = arith.constant 0 : index
    %328 = vector.load %arg6[%c2_279, %c6_280, %c0_281] : memref<4x22x16xf32, #tpu.memory_space<vmem>>, vector<1x16x16xf32>
    %329 = vector.shape_cast %328 : vector<1x16x16xf32> to vector<16x16xf32>
    %330 = vector.broadcast %327 : f32 to vector<16x16xf32>
    %331 = arith.mulf %330, %329 : vector<16x16xf32>
    %332 = arith.addf %326, %331 : vector<16x16xf32>
    %c0_282 = arith.constant 0 : index
    %c6_283 = arith.constant 6 : index
    %c0_284 = arith.constant 0 : index
    %c0_285 = arith.constant 0 : index
    %333 = vector.load %arg5[%c0_282, %c6_283, %c0_284, %c0_285] : memref<1x12x16x16xf32, #tpu.memory_space<vmem>>, vector<1x1x16x16xf32>
    %334 = vector.shape_cast %333 : vector<1x1x16x16xf32> to vector<16x16xf32>
    %335 = vector.shape_cast %332 : vector<16x16xf32> to vector<1x1x16x16xf32>
    tpu.vector_store %arg5[%c0_282, %c6_283, %c0_284, %c0_285], %335 {strides = array<i32>} : memref<1x12x16x16xf32, #tpu.memory_space<vmem>>, vector<1x1x16x16xf32>,
    %c7 = arith.constant 7 : index
    %336 = memref.load %arg4[%c7] : memref<12xf32, #tpu.memory_space<smem>>
    %337 = vector.broadcast %336 : f32 to vector<16x16xf32>
    %c0_286 = arith.constant 0 : index
    %c7_287 = arith.constant 7 : index
    %338 = memref.load %arg3[%c0_286, %c7_287] : memref<7x12xf32, #tpu.memory_space<smem>>
    %c2_288 = arith.constant 2 : index
    %c0_289 = arith.constant 0 : index
    %c0_290 = arith.constant 0 : index
    %339 = vector.load %arg6[%c2_288, %c0_289, %c0_290] : memref<4x22x16xf32, #tpu.memory_space<vmem>>, vector<1x16x16xf32>
    %340 = vector.shape_cast %339 : vector<1x16x16xf32> to vector<16x16xf32>
    %341 = vector.broadcast %338 : f32 to vector<16x16xf32>
    %342 = arith.mulf %341, %340 : vector<16x16xf32>
    %343 = arith.addf %337, %342 : vector<16x16xf32>
    %c1_291 = arith.constant 1 : index
    %c7_292 = arith.constant 7 : index
    %344 = memref.load %arg3[%c1_291, %c7_292] : memref<7x12xf32, #tpu.memory_space<smem>>
    %c2_293 = arith.constant 2 : index
    %c1_294 = arith.constant 1 : index
    %c0_295 = arith.constant 0 : index
    %345 = vector.load %arg6[%c2_293, %c1_294, %c0_295] : memref<4x22x16xf32, #tpu.memory_space<vmem>>, vector<1x16x16xf32>
    %346 = vector.shape_cast %345 : vector<1x16x16xf32> to vector<16x16xf32>
    %347 = vector.broadcast %344 : f32 to vector<16x16xf32>
    %348 = arith.mulf %347, %346 : vector<16x16xf32>
    %349 = arith.addf %343, %348 : vector<16x16xf32>
    %c2_296 = arith.constant 2 : index
    %c7_297 = arith.constant 7 : index
    %350 = memref.load %arg3[%c2_296, %c7_297] : memref<7x12xf32, #tpu.memory_space<smem>>
    %c2_298 = arith.constant 2 : index
    %c2_299 = arith.constant 2 : index
    %c0_300 = arith.constant 0 : index
    %351 = vector.load %arg6[%c2_298, %c2_299, %c0_300] : memref<4x22x16xf32, #tpu.memory_space<vmem>>, vector<1x16x16xf32>
    %352 = vector.shape_cast %351 : vector<1x16x16xf32> to vector<16x16xf32>
    %353 = vector.broadcast %350 : f32 to vector<16x16xf32>
    %354 = arith.mulf %353, %352 : vector<16x16xf32>
    %355 = arith.addf %349, %354 : vector<16x16xf32>
    %c3_301 = arith.constant 3 : index
    %c7_302 = arith.constant 7 : index
    %356 = memref.load %arg3[%c3_301, %c7_302] : memref<7x12xf32, #tpu.memory_space<smem>>
    %c2_303 = arith.constant 2 : index
    %c3_304 = arith.constant 3 : index
    %c0_305 = arith.constant 0 : index
    %357 = vector.load %arg6[%c2_303, %c3_304, %c0_305] : memref<4x22x16xf32, #tpu.memory_space<vmem>>, vector<1x16x16xf32>
    %358 = vector.shape_cast %357 : vector<1x16x16xf32> to vector<16x16xf32>
    %359 = vector.broadcast %356 : f32 to vector<16x16xf32>
    %360 = arith.mulf %359, %358 : vector<16x16xf32>
    %361 = arith.addf %355, %360 : vector<16x16xf32>
    %c4_306 = arith.constant 4 : index
    %c7_307 = arith.constant 7 : index
    %362 = memref.load %arg3[%c4_306, %c7_307] : memref<7x12xf32, #tpu.memory_space<smem>>
    %c2_308 = arith.constant 2 : index
    %c4_309 = arith.constant 4 : index
    %c0_310 = arith.constant 0 : index
    %363 = vector.load %arg6[%c2_308, %c4_309, %c0_310] : memref<4x22x16xf32, #tpu.memory_space<vmem>>, vector<1x16x16xf32>
    %364 = vector.shape_cast %363 : vector<1x16x16xf32> to vector<16x16xf32>
    %365 = vector.broadcast %362 : f32 to vector<16x16xf32>
    %366 = arith.mulf %365, %364 : vector<16x16xf32>
    %367 = arith.addf %361, %366 : vector<16x16xf32>
    %c5_311 = arith.constant 5 : index
    %c7_312 = arith.constant 7 : index
    %368 = memref.load %arg3[%c5_311, %c7_312] : memref<7x12xf32, #tpu.memory_space<smem>>
    %c2_313 = arith.constant 2 : index
    %c5_314 = arith.constant 5 : index
    %c0_315 = arith.constant 0 : index
    %369 = vector.load %arg6[%c2_313, %c5_314, %c0_315] : memref<4x22x16xf32, #tpu.memory_space<vmem>>, vector<1x16x16xf32>
    %370 = vector.shape_cast %369 : vector<1x16x16xf32> to vector<16x16xf32>
    %371 = vector.broadcast %368 : f32 to vector<16x16xf32>
    %372 = arith.mulf %371, %370 : vector<16x16xf32>
    %373 = arith.addf %367, %372 : vector<16x16xf32>
    %c6_316 = arith.constant 6 : index
    %c7_317 = arith.constant 7 : index
    %374 = memref.load %arg3[%c6_316, %c7_317] : memref<7x12xf32, #tpu.memory_space<smem>>
    %c2_318 = arith.constant 2 : index
    %c6_319 = arith.constant 6 : index
    %c0_320 = arith.constant 0 : index
    %375 = vector.load %arg6[%c2_318, %c6_319, %c0_320] : memref<4x22x16xf32, #tpu.memory_space<vmem>>, vector<1x16x16xf32>
    %376 = vector.shape_cast %375 : vector<1x16x16xf32> to vector<16x16xf32>
    %377 = vector.broadcast %374 : f32 to vector<16x16xf32>
    %378 = arith.mulf %377, %376 : vector<16x16xf32>
    %379 = arith.addf %373, %378 : vector<16x16xf32>
    %c0_321 = arith.constant 0 : index
    %c7_322 = arith.constant 7 : index
    %c0_323 = arith.constant 0 : index
    %c0_324 = arith.constant 0 : index
    %380 = vector.load %arg5[%c0_321, %c7_322, %c0_323, %c0_324] : memref<1x12x16x16xf32, #tpu.memory_space<vmem>>, vector<1x1x16x16xf32>
    %381 = vector.shape_cast %380 : vector<1x1x16x16xf32> to vector<16x16xf32>
    %382 = vector.shape_cast %379 : vector<16x16xf32> to vector<1x1x16x16xf32>
    tpu.vector_store %arg5[%c0_321, %c7_322, %c0_323, %c0_324], %382 {strides = array<i32>} : memref<1x12x16x16xf32, #tpu.memory_space<vmem>>, vector<1x1x16x16xf32>,
    %c8 = arith.constant 8 : index
    %383 = memref.load %arg4[%c8] : memref<12xf32, #tpu.memory_space<smem>>
    %384 = vector.broadcast %383 : f32 to vector<16x16xf32>
    %c0_325 = arith.constant 0 : index
    %c8_326 = arith.constant 8 : index
    %385 = memref.load %arg3[%c0_325, %c8_326] : memref<7x12xf32, #tpu.memory_space<smem>>
    %c2_327 = arith.constant 2 : index
    %c0_328 = arith.constant 0 : index
    %c0_329 = arith.constant 0 : index
    %386 = vector.load %arg6[%c2_327, %c0_328, %c0_329] : memref<4x22x16xf32, #tpu.memory_space<vmem>>, vector<1x16x16xf32>
    %387 = vector.shape_cast %386 : vector<1x16x16xf32> to vector<16x16xf32>
    %388 = vector.broadcast %385 : f32 to vector<16x16xf32>
    %389 = arith.mulf %388, %387 : vector<16x16xf32>
    %390 = arith.addf %384, %389 : vector<16x16xf32>
    %c1_330 = arith.constant 1 : index
    %c8_331 = arith.constant 8 : index
    %391 = memref.load %arg3[%c1_330, %c8_331] : memref<7x12xf32, #tpu.memory_space<smem>>
    %c2_332 = arith.constant 2 : index
    %c1_333 = arith.constant 1 : index
    %c0_334 = arith.constant 0 : index
    %392 = vector.load %arg6[%c2_332, %c1_333, %c0_334] : memref<4x22x16xf32, #tpu.memory_space<vmem>>, vector<1x16x16xf32>
    %393 = vector.shape_cast %392 : vector<1x16x16xf32> to vector<16x16xf32>
    %394 = vector.broadcast %391 : f32 to vector<16x16xf32>
    %395 = arith.mulf %394, %393 : vector<16x16xf32>
    %396 = arith.addf %390, %395 : vector<16x16xf32>
    %c2_335 = arith.constant 2 : index
    %c8_336 = arith.constant 8 : index
    %397 = memref.load %arg3[%c2_335, %c8_336] : memref<7x12xf32, #tpu.memory_space<smem>>
    %c2_337 = arith.constant 2 : index
    %c2_338 = arith.constant 2 : index
    %c0_339 = arith.constant 0 : index
    %398 = vector.load %arg6[%c2_337, %c2_338, %c0_339] : memref<4x22x16xf32, #tpu.memory_space<vmem>>, vector<1x16x16xf32>
    %399 = vector.shape_cast %398 : vector<1x16x16xf32> to vector<16x16xf32>
    %400 = vector.broadcast %397 : f32 to vector<16x16xf32>
    %401 = arith.mulf %400, %399 : vector<16x16xf32>
    %402 = arith.addf %396, %401 : vector<16x16xf32>
    %c3_340 = arith.constant 3 : index
    %c8_341 = arith.constant 8 : index
    %403 = memref.load %arg3[%c3_340, %c8_341] : memref<7x12xf32, #tpu.memory_space<smem>>
    %c2_342 = arith.constant 2 : index
    %c3_343 = arith.constant 3 : index
    %c0_344 = arith.constant 0 : index
    %404 = vector.load %arg6[%c2_342, %c3_343, %c0_344] : memref<4x22x16xf32, #tpu.memory_space<vmem>>, vector<1x16x16xf32>
    %405 = vector.shape_cast %404 : vector<1x16x16xf32> to vector<16x16xf32>
    %406 = vector.broadcast %403 : f32 to vector<16x16xf32>
    %407 = arith.mulf %406, %405 : vector<16x16xf32>
    %408 = arith.addf %402, %407 : vector<16x16xf32>
    %c4_345 = arith.constant 4 : index
    %c8_346 = arith.constant 8 : index
    %409 = memref.load %arg3[%c4_345, %c8_346] : memref<7x12xf32, #tpu.memory_space<smem>>
    %c2_347 = arith.constant 2 : index
    %c4_348 = arith.constant 4 : index
    %c0_349 = arith.constant 0 : index
    %410 = vector.load %arg6[%c2_347, %c4_348, %c0_349] : memref<4x22x16xf32, #tpu.memory_space<vmem>>, vector<1x16x16xf32>
    %411 = vector.shape_cast %410 : vector<1x16x16xf32> to vector<16x16xf32>
    %412 = vector.broadcast %409 : f32 to vector<16x16xf32>
    %413 = arith.mulf %412, %411 : vector<16x16xf32>
    %414 = arith.addf %408, %413 : vector<16x16xf32>
    %c5_350 = arith.constant 5 : index
    %c8_351 = arith.constant 8 : index
    %415 = memref.load %arg3[%c5_350, %c8_351] : memref<7x12xf32, #tpu.memory_space<smem>>
    %c2_352 = arith.constant 2 : index
    %c5_353 = arith.constant 5 : index
    %c0_354 = arith.constant 0 : index
    %416 = vector.load %arg6[%c2_352, %c5_353, %c0_354] : memref<4x22x16xf32, #tpu.memory_space<vmem>>, vector<1x16x16xf32>
    %417 = vector.shape_cast %416 : vector<1x16x16xf32> to vector<16x16xf32>
    %418 = vector.broadcast %415 : f32 to vector<16x16xf32>
    %419 = arith.mulf %418, %417 : vector<16x16xf32>
    %420 = arith.addf %414, %419 : vector<16x16xf32>
    %c6_355 = arith.constant 6 : index
    %c8_356 = arith.constant 8 : index
    %421 = memref.load %arg3[%c6_355, %c8_356] : memref<7x12xf32, #tpu.memory_space<smem>>
    %c2_357 = arith.constant 2 : index
    %c6_358 = arith.constant 6 : index
    %c0_359 = arith.constant 0 : index
    %422 = vector.load %arg6[%c2_357, %c6_358, %c0_359] : memref<4x22x16xf32, #tpu.memory_space<vmem>>, vector<1x16x16xf32>
    %423 = vector.shape_cast %422 : vector<1x16x16xf32> to vector<16x16xf32>
    %424 = vector.broadcast %421 : f32 to vector<16x16xf32>
    %425 = arith.mulf %424, %423 : vector<16x16xf32>
    %426 = arith.addf %420, %425 : vector<16x16xf32>
    %c0_360 = arith.constant 0 : index
    %c8_361 = arith.constant 8 : index
    %c0_362 = arith.constant 0 : index
    %c0_363 = arith.constant 0 : index
    %427 = vector.load %arg5[%c0_360, %c8_361, %c0_362, %c0_363] : memref<1x12x16x16xf32, #tpu.memory_space<vmem>>, vector<1x1x16x16xf32>
    %428 = vector.shape_cast %427 : vector<1x1x16x16xf32> to vector<16x16xf32>
    %429 = vector.shape_cast %426 : vector<16x16xf32> to vector<1x1x16x16xf32>
    tpu.vector_store %arg5[%c0_360, %c8_361, %c0_362, %c0_363], %429 {strides = array<i32>} : memref<1x12x16x16xf32, #tpu.memory_space<vmem>>, vector<1x1x16x16xf32>,
    %c9 = arith.constant 9 : index
    %430 = memref.load %arg4[%c9] : memref<12xf32, #tpu.memory_space<smem>>
    %431 = vector.broadcast %430 : f32 to vector<16x16xf32>
    %c0_364 = arith.constant 0 : index
    %c9_365 = arith.constant 9 : index
    %432 = memref.load %arg3[%c0_364, %c9_365] : memref<7x12xf32, #tpu.memory_space<smem>>
    %c3_366 = arith.constant 3 : index
    %c0_367 = arith.constant 0 : index
    %c0_368 = arith.constant 0 : index
    %433 = vector.load %arg6[%c3_366, %c0_367, %c0_368] : memref<4x22x16xf32, #tpu.memory_space<vmem>>, vector<1x16x16xf32>
    %434 = vector.shape_cast %433 : vector<1x16x16xf32> to vector<16x16xf32>
    %435 = vector.broadcast %432 : f32 to vector<16x16xf32>
    %436 = arith.mulf %435, %434 : vector<16x16xf32>
    %437 = arith.addf %431, %436 : vector<16x16xf32>
    %c1_369 = arith.constant 1 : index
    %c9_370 = arith.constant 9 : index
    %438 = memref.load %arg3[%c1_369, %c9_370] : memref<7x12xf32, #tpu.memory_space<smem>>
    %c3_371 = arith.constant 3 : index
    %c1_372 = arith.constant 1 : index
    %c0_373 = arith.constant 0 : index
    %439 = vector.load %arg6[%c3_371, %c1_372, %c0_373] : memref<4x22x16xf32, #tpu.memory_space<vmem>>, vector<1x16x16xf32>
    %440 = vector.shape_cast %439 : vector<1x16x16xf32> to vector<16x16xf32>
    %441 = vector.broadcast %438 : f32 to vector<16x16xf32>
    %442 = arith.mulf %441, %440 : vector<16x16xf32>
    %443 = arith.addf %437, %442 : vector<16x16xf32>
    %c2_374 = arith.constant 2 : index
    %c9_375 = arith.constant 9 : index
    %444 = memref.load %arg3[%c2_374, %c9_375] : memref<7x12xf32, #tpu.memory_space<smem>>
    %c3_376 = arith.constant 3 : index
    %c2_377 = arith.constant 2 : index
    %c0_378 = arith.constant 0 : index
    %445 = vector.load %arg6[%c3_376, %c2_377, %c0_378] : memref<4x22x16xf32, #tpu.memory_space<vmem>>, vector<1x16x16xf32>
    %446 = vector.shape_cast %445 : vector<1x16x16xf32> to vector<16x16xf32>
    %447 = vector.broadcast %444 : f32 to vector<16x16xf32>
    %448 = arith.mulf %447, %446 : vector<16x16xf32>
    %449 = arith.addf %443, %448 : vector<16x16xf32>
    %c3_379 = arith.constant 3 : index
    %c9_380 = arith.constant 9 : index
    %450 = memref.load %arg3[%c3_379, %c9_380] : memref<7x12xf32, #tpu.memory_space<smem>>
    %c3_381 = arith.constant 3 : index
    %c3_382 = arith.constant 3 : index
    %c0_383 = arith.constant 0 : index
    %451 = vector.load %arg6[%c3_381, %c3_382, %c0_383] : memref<4x22x16xf32, #tpu.memory_space<vmem>>, vector<1x16x16xf32>
    %452 = vector.shape_cast %451 : vector<1x16x16xf32> to vector<16x16xf32>
    %453 = vector.broadcast %450 : f32 to vector<16x16xf32>
    %454 = arith.mulf %453, %452 : vector<16x16xf32>
    %455 = arith.addf %449, %454 : vector<16x16xf32>
    %c4_384 = arith.constant 4 : index
    %c9_385 = arith.constant 9 : index
    %456 = memref.load %arg3[%c4_384, %c9_385] : memref<7x12xf32, #tpu.memory_space<smem>>
    %c3_386 = arith.constant 3 : index
    %c4_387 = arith.constant 4 : index
    %c0_388 = arith.constant 0 : index
    %457 = vector.load %arg6[%c3_386, %c4_387, %c0_388] : memref<4x22x16xf32, #tpu.memory_space<vmem>>, vector<1x16x16xf32>
    %458 = vector.shape_cast %457 : vector<1x16x16xf32> to vector<16x16xf32>
    %459 = vector.broadcast %456 : f32 to vector<16x16xf32>
    %460 = arith.mulf %459, %458 : vector<16x16xf32>
    %461 = arith.addf %455, %460 : vector<16x16xf32>
    %c5_389 = arith.constant 5 : index
    %c9_390 = arith.constant 9 : index
    %462 = memref.load %arg3[%c5_389, %c9_390] : memref<7x12xf32, #tpu.memory_space<smem>>
    %c3_391 = arith.constant 3 : index
    %c5_392 = arith.constant 5 : index
    %c0_393 = arith.constant 0 : index
    %463 = vector.load %arg6[%c3_391, %c5_392, %c0_393] : memref<4x22x16xf32, #tpu.memory_space<vmem>>, vector<1x16x16xf32>
    %464 = vector.shape_cast %463 : vector<1x16x16xf32> to vector<16x16xf32>
    %465 = vector.broadcast %462 : f32 to vector<16x16xf32>
    %466 = arith.mulf %465, %464 : vector<16x16xf32>
    %467 = arith.addf %461, %466 : vector<16x16xf32>
    %c6_394 = arith.constant 6 : index
    %c9_395 = arith.constant 9 : index
    %468 = memref.load %arg3[%c6_394, %c9_395] : memref<7x12xf32, #tpu.memory_space<smem>>
    %c3_396 = arith.constant 3 : index
    %c6_397 = arith.constant 6 : index
    %c0_398 = arith.constant 0 : index
    %469 = vector.load %arg6[%c3_396, %c6_397, %c0_398] : memref<4x22x16xf32, #tpu.memory_space<vmem>>, vector<1x16x16xf32>
    %470 = vector.shape_cast %469 : vector<1x16x16xf32> to vector<16x16xf32>
    %471 = vector.broadcast %468 : f32 to vector<16x16xf32>
    %472 = arith.mulf %471, %470 : vector<16x16xf32>
    %473 = arith.addf %467, %472 : vector<16x16xf32>
    %c0_399 = arith.constant 0 : index
    %c9_400 = arith.constant 9 : index
    %c0_401 = arith.constant 0 : index
    %c0_402 = arith.constant 0 : index
    %474 = vector.load %arg5[%c0_399, %c9_400, %c0_401, %c0_402] : memref<1x12x16x16xf32, #tpu.memory_space<vmem>>, vector<1x1x16x16xf32>
    %475 = vector.shape_cast %474 : vector<1x1x16x16xf32> to vector<16x16xf32>
    %476 = vector.shape_cast %473 : vector<16x16xf32> to vector<1x1x16x16xf32>
    tpu.vector_store %arg5[%c0_399, %c9_400, %c0_401, %c0_402], %476 {strides = array<i32>} : memref<1x12x16x16xf32, #tpu.memory_space<vmem>>, vector<1x1x16x16xf32>,
    %c10 = arith.constant 10 : index
    %477 = memref.load %arg4[%c10] : memref<12xf32, #tpu.memory_space<smem>>
    %478 = vector.broadcast %477 : f32 to vector<16x16xf32>
    %c0_403 = arith.constant 0 : index
    %c10_404 = arith.constant 10 : index
    %479 = memref.load %arg3[%c0_403, %c10_404] : memref<7x12xf32, #tpu.memory_space<smem>>
    %c3_405 = arith.constant 3 : index
    %c0_406 = arith.constant 0 : index
    %c0_407 = arith.constant 0 : index
    %480 = vector.load %arg6[%c3_405, %c0_406, %c0_407] : memref<4x22x16xf32, #tpu.memory_space<vmem>>, vector<1x16x16xf32>
    %481 = vector.shape_cast %480 : vector<1x16x16xf32> to vector<16x16xf32>
    %482 = vector.broadcast %479 : f32 to vector<16x16xf32>
    %483 = arith.mulf %482, %481 : vector<16x16xf32>
    %484 = arith.addf %478, %483 : vector<16x16xf32>
    %c1_408 = arith.constant 1 : index
    %c10_409 = arith.constant 10 : index
    %485 = memref.load %arg3[%c1_408, %c10_409] : memref<7x12xf32, #tpu.memory_space<smem>>
    %c3_410 = arith.constant 3 : index
    %c1_411 = arith.constant 1 : index
    %c0_412 = arith.constant 0 : index
    %486 = vector.load %arg6[%c3_410, %c1_411, %c0_412] : memref<4x22x16xf32, #tpu.memory_space<vmem>>, vector<1x16x16xf32>
    %487 = vector.shape_cast %486 : vector<1x16x16xf32> to vector<16x16xf32>
    %488 = vector.broadcast %485 : f32 to vector<16x16xf32>
    %489 = arith.mulf %488, %487 : vector<16x16xf32>
    %490 = arith.addf %484, %489 : vector<16x16xf32>
    %c2_413 = arith.constant 2 : index
    %c10_414 = arith.constant 10 : index
    %491 = memref.load %arg3[%c2_413, %c10_414] : memref<7x12xf32, #tpu.memory_space<smem>>
    %c3_415 = arith.constant 3 : index
    %c2_416 = arith.constant 2 : index
    %c0_417 = arith.constant 0 : index
    %492 = vector.load %arg6[%c3_415, %c2_416, %c0_417] : memref<4x22x16xf32, #tpu.memory_space<vmem>>, vector<1x16x16xf32>
    %493 = vector.shape_cast %492 : vector<1x16x16xf32> to vector<16x16xf32>
    %494 = vector.broadcast %491 : f32 to vector<16x16xf32>
    %495 = arith.mulf %494, %493 : vector<16x16xf32>
    %496 = arith.addf %490, %495 : vector<16x16xf32>
    %c3_418 = arith.constant 3 : index
    %c10_419 = arith.constant 10 : index
    %497 = memref.load %arg3[%c3_418, %c10_419] : memref<7x12xf32, #tpu.memory_space<smem>>
    %c3_420 = arith.constant 3 : index
    %c3_421 = arith.constant 3 : index
    %c0_422 = arith.constant 0 : index
    %498 = vector.load %arg6[%c3_420, %c3_421, %c0_422] : memref<4x22x16xf32, #tpu.memory_space<vmem>>, vector<1x16x16xf32>
    %499 = vector.shape_cast %498 : vector<1x16x16xf32> to vector<16x16xf32>
    %500 = vector.broadcast %497 : f32 to vector<16x16xf32>
    %501 = arith.mulf %500, %499 : vector<16x16xf32>
    %502 = arith.addf %496, %501 : vector<16x16xf32>
    %c4_423 = arith.constant 4 : index
    %c10_424 = arith.constant 10 : index
    %503 = memref.load %arg3[%c4_423, %c10_424] : memref<7x12xf32, #tpu.memory_space<smem>>
    %c3_425 = arith.constant 3 : index
    %c4_426 = arith.constant 4 : index
    %c0_427 = arith.constant 0 : index
    %504 = vector.load %arg6[%c3_425, %c4_426, %c0_427] : memref<4x22x16xf32, #tpu.memory_space<vmem>>, vector<1x16x16xf32>
    %505 = vector.shape_cast %504 : vector<1x16x16xf32> to vector<16x16xf32>
    %506 = vector.broadcast %503 : f32 to vector<16x16xf32>
    %507 = arith.mulf %506, %505 : vector<16x16xf32>
    %508 = arith.addf %502, %507 : vector<16x16xf32>
    %c5_428 = arith.constant 5 : index
    %c10_429 = arith.constant 10 : index
    %509 = memref.load %arg3[%c5_428, %c10_429] : memref<7x12xf32, #tpu.memory_space<smem>>
    %c3_430 = arith.constant 3 : index
    %c5_431 = arith.constant 5 : index
    %c0_432 = arith.constant 0 : index
    %510 = vector.load %arg6[%c3_430, %c5_431, %c0_432] : memref<4x22x16xf32, #tpu.memory_space<vmem>>, vector<1x16x16xf32>
    %511 = vector.shape_cast %510 : vector<1x16x16xf32> to vector<16x16xf32>
    %512 = vector.broadcast %509 : f32 to vector<16x16xf32>
    %513 = arith.mulf %512, %511 : vector<16x16xf32>
    %514 = arith.addf %508, %513 : vector<16x16xf32>
    %c6_433 = arith.constant 6 : index
    %c10_434 = arith.constant 10 : index
    %515 = memref.load %arg3[%c6_433, %c10_434] : memref<7x12xf32, #tpu.memory_space<smem>>
    %c3_435 = arith.constant 3 : index
    %c6_436 = arith.constant 6 : index
    %c0_437 = arith.constant 0 : index
    %516 = vector.load %arg6[%c3_435, %c6_436, %c0_437] : memref<4x22x16xf32, #tpu.memory_space<vmem>>, vector<1x16x16xf32>
    %517 = vector.shape_cast %516 : vector<1x16x16xf32> to vector<16x16xf32>
    %518 = vector.broadcast %515 : f32 to vector<16x16xf32>
    %519 = arith.mulf %518, %517 : vector<16x16xf32>
    %520 = arith.addf %514, %519 : vector<16x16xf32>
    %c0_438 = arith.constant 0 : index
    %c10_439 = arith.constant 10 : index
    %c0_440 = arith.constant 0 : index
    %c0_441 = arith.constant 0 : index
    %521 = vector.load %arg5[%c0_438, %c10_439, %c0_440, %c0_441] : memref<1x12x16x16xf32, #tpu.memory_space<vmem>>, vector<1x1x16x16xf32>
    %522 = vector.shape_cast %521 : vector<1x1x16x16xf32> to vector<16x16xf32>
    %523 = vector.shape_cast %520 : vector<16x16xf32> to vector<1x1x16x16xf32>
    tpu.vector_store %arg5[%c0_438, %c10_439, %c0_440, %c0_441], %523 {strides = array<i32>} : memref<1x12x16x16xf32, #tpu.memory_space<vmem>>, vector<1x1x16x16xf32>,
    %c11 = arith.constant 11 : index
    %524 = memref.load %arg4[%c11] : memref<12xf32, #tpu.memory_space<smem>>
    %525 = vector.broadcast %524 : f32 to vector<16x16xf32>
    %c0_442 = arith.constant 0 : index
    %c11_443 = arith.constant 11 : index
    %526 = memref.load %arg3[%c0_442, %c11_443] : memref<7x12xf32, #tpu.memory_space<smem>>
    %c3_444 = arith.constant 3 : index
    %c0_445 = arith.constant 0 : index
    %c0_446 = arith.constant 0 : index
    %527 = vector.load %arg6[%c3_444, %c0_445, %c0_446] : memref<4x22x16xf32, #tpu.memory_space<vmem>>, vector<1x16x16xf32>
    %528 = vector.shape_cast %527 : vector<1x16x16xf32> to vector<16x16xf32>
    %529 = vector.broadcast %526 : f32 to vector<16x16xf32>
    %530 = arith.mulf %529, %528 : vector<16x16xf32>
    %531 = arith.addf %525, %530 : vector<16x16xf32>
    %c1_447 = arith.constant 1 : index
    %c11_448 = arith.constant 11 : index
    %532 = memref.load %arg3[%c1_447, %c11_448] : memref<7x12xf32, #tpu.memory_space<smem>>
    %c3_449 = arith.constant 3 : index
    %c1_450 = arith.constant 1 : index
    %c0_451 = arith.constant 0 : index
    %533 = vector.load %arg6[%c3_449, %c1_450, %c0_451] : memref<4x22x16xf32, #tpu.memory_space<vmem>>, vector<1x16x16xf32>
    %534 = vector.shape_cast %533 : vector<1x16x16xf32> to vector<16x16xf32>
    %535 = vector.broadcast %532 : f32 to vector<16x16xf32>
    %536 = arith.mulf %535, %534 : vector<16x16xf32>
    %537 = arith.addf %531, %536 : vector<16x16xf32>
    %c2_452 = arith.constant 2 : index
    %c11_453 = arith.constant 11 : index
    %538 = memref.load %arg3[%c2_452, %c11_453] : memref<7x12xf32, #tpu.memory_space<smem>>
    %c3_454 = arith.constant 3 : index
    %c2_455 = arith.constant 2 : index
    %c0_456 = arith.constant 0 : index
    %539 = vector.load %arg6[%c3_454, %c2_455, %c0_456] : memref<4x22x16xf32, #tpu.memory_space<vmem>>, vector<1x16x16xf32>
    %540 = vector.shape_cast %539 : vector<1x16x16xf32> to vector<16x16xf32>
    %541 = vector.broadcast %538 : f32 to vector<16x16xf32>
    %542 = arith.mulf %541, %540 : vector<16x16xf32>
    %543 = arith.addf %537, %542 : vector<16x16xf32>
    %c3_457 = arith.constant 3 : index
    %c11_458 = arith.constant 11 : index
    %544 = memref.load %arg3[%c3_457, %c11_458] : memref<7x12xf32, #tpu.memory_space<smem>>
    %c3_459 = arith.constant 3 : index
    %c3_460 = arith.constant 3 : index
    %c0_461 = arith.constant 0 : index
    %545 = vector.load %arg6[%c3_459, %c3_460, %c0_461] : memref<4x22x16xf32, #tpu.memory_space<vmem>>, vector<1x16x16xf32>
    %546 = vector.shape_cast %545 : vector<1x16x16xf32> to vector<16x16xf32>
    %547 = vector.broadcast %544 : f32 to vector<16x16xf32>
    %548 = arith.mulf %547, %546 : vector<16x16xf32>
    %549 = arith.addf %543, %548 : vector<16x16xf32>
    %c4_462 = arith.constant 4 : index
    %c11_463 = arith.constant 11 : index
    %550 = memref.load %arg3[%c4_462, %c11_463] : memref<7x12xf32, #tpu.memory_space<smem>>
    %c3_464 = arith.constant 3 : index
    %c4_465 = arith.constant 4 : index
    %c0_466 = arith.constant 0 : index
    %551 = vector.load %arg6[%c3_464, %c4_465, %c0_466] : memref<4x22x16xf32, #tpu.memory_space<vmem>>, vector<1x16x16xf32>
    %552 = vector.shape_cast %551 : vector<1x16x16xf32> to vector<16x16xf32>
    %553 = vector.broadcast %550 : f32 to vector<16x16xf32>
    %554 = arith.mulf %553, %552 : vector<16x16xf32>
    %555 = arith.addf %549, %554 : vector<16x16xf32>
    %c5_467 = arith.constant 5 : index
    %c11_468 = arith.constant 11 : index
    %556 = memref.load %arg3[%c5_467, %c11_468] : memref<7x12xf32, #tpu.memory_space<smem>>
    %c3_469 = arith.constant 3 : index
    %c5_470 = arith.constant 5 : index
    %c0_471 = arith.constant 0 : index
    %557 = vector.load %arg6[%c3_469, %c5_470, %c0_471] : memref<4x22x16xf32, #tpu.memory_space<vmem>>, vector<1x16x16xf32>
    %558 = vector.shape_cast %557 : vector<1x16x16xf32> to vector<16x16xf32>
    %559 = vector.broadcast %556 : f32 to vector<16x16xf32>
    %560 = arith.mulf %559, %558 : vector<16x16xf32>
    %561 = arith.addf %555, %560 : vector<16x16xf32>
    %c6_472 = arith.constant 6 : index
    %c11_473 = arith.constant 11 : index
    %562 = memref.load %arg3[%c6_472, %c11_473] : memref<7x12xf32, #tpu.memory_space<smem>>
    %c3_474 = arith.constant 3 : index
    %c6_475 = arith.constant 6 : index
    %c0_476 = arith.constant 0 : index
    %563 = vector.load %arg6[%c3_474, %c6_475, %c0_476] : memref<4x22x16xf32, #tpu.memory_space<vmem>>, vector<1x16x16xf32>
    %564 = vector.shape_cast %563 : vector<1x16x16xf32> to vector<16x16xf32>
    %565 = vector.broadcast %562 : f32 to vector<16x16xf32>
    %566 = arith.mulf %565, %564 : vector<16x16xf32>
    %567 = arith.addf %561, %566 : vector<16x16xf32>
    %c0_477 = arith.constant 0 : index
    %c11_478 = arith.constant 11 : index
    %c0_479 = arith.constant 0 : index
    %c0_480 = arith.constant 0 : index
    %568 = vector.load %arg5[%c0_477, %c11_478, %c0_479, %c0_480] : memref<1x12x16x16xf32, #tpu.memory_space<vmem>>, vector<1x1x16x16xf32>
    %569 = vector.shape_cast %568 : vector<1x1x16x16xf32> to vector<16x16xf32>
    %570 = vector.shape_cast %567 : vector<16x16xf32> to vector<1x1x16x16xf32>
    tpu.vector_store %arg5[%c0_477, %c11_478, %c0_479, %c0_480], %570 {strides = array<i32>} : memref<1x12x16x16xf32, #tpu.memory_space<vmem>>, vector<1x1x16x16xf32>,
    return
  }
  func.func @transform_0(%arg0: i32, %arg1: i32) -> (i32, i32, i32, i32) {
    %c0_i32 = arith.constant 0 : i32
    %c0_i32_0 = arith.constant 0 : i32
    %c0_i32_1 = arith.constant 0 : i32
    return %arg0, %c0_i32, %c0_i32_0, %arg1 : i32, i32, i32, i32
  }
  func.func @transform_1(%arg0: i32, %arg1: i32) -> (i32, i32) {
    %c0_i32 = arith.constant 0 : i32
    %c0_i32_0 = arith.constant 0 : i32
    %c0_i32_1 = arith.constant 0 : i32
    return %c0_i32, %c0_i32_0 : i32, i32
  }
  func.func @transform_2(%arg0: i32, %arg1: i32) -> i32 {
    %c0_i32 = arith.constant 0 : i32
    %c0_i32_0 = arith.constant 0 : i32
    return %c0_i32 : i32
  }
  func.func @transform_3(%arg0: i32, %arg1: i32) -> (i32, i32, i32, i32) {
    %c0_i32 = arith.constant 0 : i32
    %c0_i32_0 = arith.constant 0 : i32
    %c0_i32_1 = arith.constant 0 : i32
    return %arg0, %c0_i32, %c0_i32_0, %arg1 : i32, i32, i32, i32
  }
}

</mosaic_0001>

<bundles_post_ra>
// kernel: _lambda_.1
= control target key start
LH: loop header
LB: loop body
LE: loop exit
PB: predicated region body
PF: predicated region fallthrough
CT: control target
= control target key end

     0   :  { %8 = vsyncpa [#allocation4], 0  ;;  %s2379_s0 = inlined_call_operand.hbm [shape: f32[2,4,16,16], index: 0, kind: input, shape index: {}]   ;;  %s2380_s1 = inlined_call_operand.hbm [shape: f32[7,12], index: 1, kind: input, shape index: {}]   ;;  %s2381_s2 = inlined_call_operand.vmem [shape: f32[12], index: 2, kind: input, shape index: {}]   ;;  %s2382_s3 = inlined_call_operand.hbm [shape: f32[2,12,16,16], index: 3, kind: output, shape index: {}]  }
   0x1   :  { %10 = vsyncpa [#allocation4 + $0x1], 0 }
   0x2   :  { %11 = vsyncpa [#allocation6], 0 }
   0x3   :  { %12 = vsyncpa [#allocation7], 0 }
   0x4   :  { %13 = vsyncpa [#allocation5], 0 }
   0x5   :  { %15 = vsyncpa [#allocation5 + $0x1], 0  ;;  %s1517_s12 = smov 0   ;;  %s1519_s13 = smov 0  }
   0x6   :  { %s1521_s14 = smov 0   ;;  %s1523_s15 = smov 0  }
   0x7   :  { %s1525_s16 = smov 0   ;;  %s1527_s17 = smov 0  }
   0x8 LB: > { %s1115_s18 = sadd.s32 4294967295, %s1486_s17   ;;  %s1116_s19 = sadd.s32 4294967294, %s1486_s17   ;;  %s1486_s17 = sphi %s1527_s17, %s21_s17   ;;  %s1482_s16 = sphi %s1525_s16, %s2403_s16   ;;  %s1478_s15 = sphi %s1523_s15, %s2402_s15   ;;  %s1474_s14 = sphi %s1521_s14, %s2401_s14   ;;  %s1470_s13 = sphi %s1519_s13, %s2400_s13   ;;  %s1466_s12 = sphi %s1517_s12, %s2399_s12  }
   0x9   : > { %s42_s20 = sadd.s32 1, %s1474_s14  ;;  %p49_p0 = scmp.ne.s32.totalorder %s1474_s14, %s1470_s13 }
   0xa   : > { %p50_p1 = scmp.eq.s32.totalorder %s1486_s17, 0  ;;  %p55_p2 = scmp.ne.s32.totalorder %s1470_s13, %s1466_s12 }
   0xb   : > { %p1555_p3 = scmp.eq.s32.totalorder %s1115_s18, 0  ;;  %p123_p4 = scmp.eq.s32.totalorder %s1115_s18, 1 }
   0xc   : > { %p51_p5 = por %p50_p1, %p49_p0  ;;  %p129_p6 = scmp.eq.s32.totalorder %s1116_s19, 1 }
   0xd   : > { %s2387_s21 = scalar_select %p1555_p3, 1, 0 }
   0xe   : > { %p1561_p7 = por %p1555_p3, %p55_p2  ;;  %p1565_p8 = por %p123_p4, %p49_p0 }
   0xf   : > { %p1569_p9 = por %p129_p6, %p55_p2  ;;  %p1117_p10 = scmp.ge.s32.totalorder %s1486_s17, 1 }
  0x10   : > { %s2388_s22 = scalar_select %p1561_p7, 1, 0 }
  0x11   : > { %s2389_s23 = scalar_select %p1565_p8, 1, 0 }
  0x12   : > { %s2390_s24 = scalar_select %p1569_p9, 1, 0 }
  0x13   : > { %p136_p11 = scmp.lt.s32.totalorder %s1486_s17, 3  ;;  %p1279_p1 = scmp.lt.s32.totalorder %s1486_s17, 2 }
  0x14   : > { %s158_s28 = sshll.u32 %s2381_s2, 4  ;;  %s169_s4 = sand.u32 1, %s1474_s14   ;;  %s159_s28 = int_to_ptr.vmem [resolvable:$true] %s158_s28 }
  0x15   : > { %p1576_p13 = pnand %p1117_p10, %p136_p11  ;;  %p1586_p4 = pnand %p1279_p1, %p51_p5 }
  0x16   : > { %s33_s5 = sadd.s32 1, %s1482_s16  ;;  %s1338_s8 = scalar_lea.hbm %s2380_s1, 128 }
  0x17   : > { %p1262_p0 = pneg %p1576_p13  ;;  %p1339_p5 = scmp.ne.s32.totalorder %s2380_s1, %s1338_s8 }
  0x18   : > { %p1345_p1 = scmp.lt.u32.totalorder %s1338_s8, %s2380_s1 }
  0x19   : > { %p1592_p2 = pnand %p1262_p0, %p1555_p3 }
  0x1b   : > { %p1340_p6 = pneg %p1592_p2 }
  0x1d   : > { %p1341_p10 = pnand %p1340_p6, %p1339_p5 }
  0x1f   : > { %p1342_p11 = pneg %p1341_p10 }
  0x21   : > { %p1347_p0 = pnand %p1345_p1, %p1342_p11 }
  0x23   : > { %1350 = shalt.err (!%p1347_p0)
}
  0x24   : > { %s1488_s19 = smov [#allocation8]   ;;  %s1351_s6 = scalar_lea.vmem %s159_s28, 16 }
  0x25   : > { %1265 = dma.hbm_to_smem (!%p1592_p2), %s2380_s1, 128, %s1488_s19, [#allocation6]  }
  0x26   : > { %p1352_p12 = scmp.ne.s32.totalorder %s159_s28, %s1351_s6  ;;  %p1359_p3 = scmp.lt.s32.totalorder %s159_s28, %s159_s28 }
  0x27   : > { %p1360_p5 = scmp.lt.s32.totalorder %s1351_s6, %s1351_s6 }
  0x28   : > { %p1354_p9 = pnand %p1352_p12, %p1340_p6 }
  0x29   : > { %p1361_p10 = por %p1360_p5, %p1359_p3 }
  0x2a   : > { %p1355_p8 = pneg %p1354_p9 }
  0x2c   : > { %p1362_p7 = pnand %p1361_p10, %p1355_p8 }
  0x2e   : > { %1365 = shalt.err (!%p1362_p7)
}
  0x2f   : > { %s1489_s7 = smov [#allocation9]   ;;  %p35_p11 = scmp.ge.s32.totalorder %s33_s5, 2 }
  0x30   : > { %1268 = dma.vmem_to_smem (!%p1592_p2), %s159_s28, 16, %s1489_s7, [#allocation7]  }
  0x31   : > { %s1121_s8 = sshll.u32 %s169_s4, 6  ;;  %s1247_s9 = sshll.u32 %s1482_s16, 10 }
  0x32   : > { %s2405_s5 = smov (%p35_p11, %s33_s5), 0  ;;  %s1624_s30 = scalar_lea.hbm %s2379_s0, %s1247_s9 }
  0x33   : > { %s37_s18 = ssub.s32 %s1482_s16, %s2405_s5  ;;  %s173_s19 = scalar_lea.vmem [#allocation3], %s1121_s8 }
  0x34   : > { %s181_s28 = sshll.u32 %s173_s19, 4  ;;  %p40_p3 = scmp.eq.s32.totalorder %s37_s18, 0  ;;  %s1628_s28 = int_to_ptr.vmem [resolvable:$true] %s181_s28 }
  0x35   : > { %s1637_s27 = scalar_lea.sflag [#allocation4], %s169_s4  ;;  %s1366_s6 = scalar_lea.hbm %s1624_s30, 1024 }
  0x36   : > { %s1633_s26 = scalar_select %p40_p3, %s1474_s14, %s42_s20  }
  0x37   : > { %p1367_p7 = scmp.ne.s32.totalorder %s1624_s30, %s1366_s6  ;;  %p1368_p8 = pneg %p1586_p4 }
  0x38   : > { %s1371_s9 = scalar_lea.hbm %s2379_s0, 2048  ;;  %p1372_p2 = scmp.lt.u32.totalorder %s1624_s30, %s2379_s0 }
  0x39   : > { %p1369_p9 = pnand %p1368_p8, %p1367_p7  ;;  %p1373_p6 = scmp.lt.u32.totalorder %s1371_s9, %s1366_s6 }
  0x3a   : > { %p1375_p0 = scmp.lt.u32.totalorder %s1366_s6, %s1624_s30 }
  0x3b   : > { %p1370_p12 = pneg %p1369_p9  ;;  %p1374_p1 = por %p1373_p6, %p1372_p2 }
  0x3d   : > { %p1376_p5 = por %p1375_p0, %p1374_p1 }
  0x3f   : > { %p1377_p10 = pnand %p1376_p5, %p1370_p12 }
  0x41   : > { %1380 = shalt.err (!%p1377_p10)
}
  0x42   : > { %s1381_s20 = scalar_lea.vmem %s1628_s28, 1024  ;;  %s1490_s4 = smov [#allocation3]  }
  0x43   : > { %p1382_p11 = scmp.ne.s32.totalorder %s1628_s28, %s1381_s20  ;;  %s1386_s18 = sshll.u32 %s1490_s4, 4  ;;  %s1387_s18 = int_to_ptr.vmem [resolvable:$false] %s1386_s18 }
  0x44   : > { %s1388_s19 = scalar_lea.vmem %s1387_s18, 2048  ;;  %p1389_p9 = scmp.lt.s32.totalorder %s1628_s28, %s1387_s18 }
  0x45   : > { %p1384_p3 = pnand %p1382_p11, %p1368_p8  ;;  %p1390_p2 = scmp.lt.s32.totalorder %s1388_s19, %s1381_s20 }
  0x47   : > { %p1385_p7 = pneg %p1384_p3  ;;  %p1391_p6 = por %p1390_p2, %p1389_p9 }
  0x49   : > { %p1392_p1 = pnand %p1391_p6, %p1385_p7 }
  0x4b   : > { %1395 = shalt.err (!%p1392_p1)
}
  0x4c   : > { %s1491_s6 = smov 128   ;;  %s1492_s7 = smov 8  }
  0x4d   : > { %1272 = dma.hbm_to_vmem [thread:$0]  (!%p1586_p4), %s1624_s30, 1024, %s1628_s28, %s1637_s27, %s1491_s6, %s1491_s6, %s1492_s7  }
  0x4e   : > { %193 = sbr.rel (%p1576_p13) target bundleno = 235 (0xeb), region = 32  ;;  %s1668_s8 = sand.u32 (!%p1576_p13), 1, %s1470_s13  }
  0x4f   : > { %s1125_s9 = sshll.u32 (!%p1576_p13), %s1668_s8, 6  ;;  %s196_s10 = scalar_lea.sflag (!%p1576_p13), [#allocation4], %s1668_s8 }
  0x50   : > { %s1672_s11 = scalar_lea.vmem (!%p1576_p13), [#allocation3], %s1125_s9  ;;  %p2394_p8 = scmp.ne.s32.totalorder (!%p1576_p13), %s2388_s22, 0 }
  0x55   : > { %1449 = dma.done.wait (%p2394_p8), %s196_s10, 1024  }
  0x56   : > { %1451 = vsyncadd (%p2394_p8), %s196_s10, 4294966272  ;;  %p2395_p4 = scmp.ne.s32.totalorder %s2387_s21, 0 }
  0x58   : > { %1453 = dma.done.wait (%p2395_p4), [#allocation6], 128  }
  0x59   : > { %1455 = vsyncadd (%p2395_p4), [#allocation6], 4294967168 }
  0x5a   : > { %1457 = dma.done.wait (%p2395_p4), [#allocation7], 16  }
  0x5b   : > { %1459 = vsyncadd (%p2395_p4), [#allocation7], 4294967280 }
  0x5c   : > { %212 = sfence }
  0x5d   : > { %vm231_vm0 = vcmask 124928   ;;  %v240_v0 = vld [vmem:[%s1672_s11] sm:$0xff]  ;;  %vm248_vm1 = vcmask 130048   ;;  %v241_v1 = vld [vmem:[%s1672_s11 + $0x8] sm:$0xff]  ;;  %v242_v2 = vld [vmem:[%s1672_s11 + $0x10] sm:$0xff]  ;;  %v1493_v3 = vmov 0.0  }
  0x5e   : > { %232 = vst.msk [vmem:[#allocation2] sm:$0x7] %vm231_vm0, %v1493_v3  ;;  %233 = vst.msk [vmem:[#allocation2 + $0x18] sm:$0x7] %vm231_vm0, %v1493_v3  ;;  %v243_v4 = vld [vmem:[%s1672_s11 + $0x18] sm:$0xff]  ;;  %v244_v5 = vld [vmem:[%s1672_s11 + $0x20] sm:$0xff] }
  0x5f   : > { %234 = vst.msk [vmem:[#allocation2 + $0x30] sm:$0x7] %vm231_vm0, %v1493_v3  ;;  %235 = vst.msk [vmem:[#allocation2 + $0x48] sm:$0x7] %vm231_vm0, %v1493_v3  ;;  %v245_v6 = vld [vmem:[%s1672_s11 + $0x28] sm:$0xff]  ;;  %s1695_s21 = sld [smem:[#allocation9]] }
  0x60   : > { %236 = vst.msk [vmem:[#allocation2 + $0x13] sm:$0x7] %vm231_vm0, %v1493_v3  ;;  %237 = vst.msk [vmem:[#allocation2 + $0x2b] sm:$0x7] %vm231_vm0, %v1493_v3  ;;  %v246_v7 = vld [vmem:[%s1672_s11 + $0x30] sm:$0xff]  ;;  %v247_v8 = vld [vmem:[%s1672_s11 + $0x38] sm:$0xff] }
  0x61   : > { %238 = vst.msk [vmem:[#allocation2 + $0x43] sm:$0x7] %vm231_vm0, %v1493_v3  ;;  %239 = vst.msk [vmem:[#allocation2 + $0x5b] sm:$0x7] %vm231_vm0, %v1493_v3  ;;  %s1702_s22 = sld [smem:[#allocation8]]  ;;  %s1718_s4 = sld [smem:[#allocation9 + $0x1]] }
  0x62   : > { %249 = vst.msk [vmem:[#allocation2 + $0x3] sm:$0xff] %vm248_vm1, %v240_v0  ;;  %250 = vst.msk [vmem:[#allocation2 + $0xb] sm:$0xff] %vm248_vm1, %v241_v1  ;;  %s1704_s25 = sld [smem:[#allocation8 + $0x80]]  ;;  %s1720_s18 = sld [smem:[#allocation8 + $0x1]] }
  0x63   : > { %251 = vst.msk [vmem:[#allocation2 + $0x1b] sm:$0xff] %vm248_vm1, %v242_v2  ;;  %252 = vst.msk [vmem:[#allocation2 + $0x23] sm:$0xff] %vm248_vm1, %v243_v4  ;;  %s1708_s29 = sld [smem:[#allocation8 + $0x100]]  ;;  %s1722_s19 = sld [smem:[#allocation8 + $0x81]] }
  0x64   : > { %253 = vst.msk [vmem:[#allocation2 + $0x33] sm:$0xff] %vm248_vm1, %v244_v5  ;;  %254 = vst.msk [vmem:[#allocation2 + $0x3b] sm:$0xff] %vm248_vm1, %v245_v6  ;;  %s1710_s30 = sld [smem:[#allocation8 + $0x180]]  ;;  %s1732_s6 = sld [smem:[#allocation8 + $0x101]] }
  0x65   : > { %255 = vst.msk [vmem:[#allocation2 + $0x4b] sm:$0xff] %vm248_vm1, %v246_v7  ;;  %256 = vst.msk [vmem:[#allocation2 + $0x53] sm:$0xff] %vm248_vm1, %v247_v8  ;;  %s1712_s28 = sld [smem:[#allocation8 + $0x200]]  ;;  %v258_v9 = vstv %s1695_s21  ;;  %s1742_s7 = sld [smem:[#allocation8 + $0x181]] }
  0x66   : > { %s1714_s27 = sld [smem:[#allocation8 + $0x280]]  ;;  %s1753_s9 = sld [smem:[#allocation8 + $0x201]] }
  0x67   : > { %s1716_s20 = sld [smem:[#allocation8 + $0x300]]  ;;  %v262_v11 = vstv %s1702_s22  ;;  %s1770_s10 = sld [smem:[#allocation8 + $0x281]]  ;;  %v318_v41 = vstv %s1718_s4 }
  0x68   : > { %v270_v13 = vstv %s1704_s25  ;;  %v322_v42 = vstv %s1720_s18  ;;  %s1775_s11 = sld [smem:[#allocation8 + $0x301]]  ;;  %s1782_s21 = sld [smem:[#allocation9 + $0x2]] }
  0x69   : > { %v1725_v10 = vld [vmem:[#allocation2] sm:$0xff]  ;;  %v278_v16 = vstv %s1708_s29  ;;  %v1740_v19 = vld [vmem:[#allocation2 + $0x8] sm:$0xff]  ;;  %v330_v43 = vstv %s1722_s19  ;;  %s1784_s22 = sld [smem:[#allocation8 + $0x2]]  ;;  %s1248_s29 = smul.u32 192, %s1668_s8 }
  0x6a   : > { %v1728_v12 = vld [vmem:[#allocation2 + $0x1] sm:$0xff]  ;;  %v263_v14 = vmul.f32 %v262_v11, %v1725_v10  ;;  %v286_v18 = vstv %s1710_s30  ;;  %v1751_v26 = vld [vmem:[#allocation2 + $0x9] sm:$0xff]  ;;  %v264_v27 = vmul.f32 %v262_v11, %v1740_v19  ;;  %v323_v48 = vmul.f32 %v322_v42, %v1725_v10  ;;  %s1791_s25 = sld [smem:[#allocation8 + $0x82]]  ;;  %s1828_s19 = sld [smem:[#allocation9 + $0x3]] }
  0x6b   : > { %v1734_v15 = vld [vmem:[#allocation2 + $0x2] sm:$0xff]  ;;  %v271_v21 = vmul.f32 %v270_v13, %v1728_v12  ;;  %v294_v23 = vstv %s1712_s28  ;;  %v1761_v33 = vld [vmem:[#allocation2 + $0xa] sm:$0xff]  ;;  %v272_v37 = vmul.f32 %v270_v13, %v1751_v26  ;;  %v338_v53 = vstv %s1732_s6  ;;  %s1796_s30 = sld [smem:[#allocation8 + $0x102]]  ;;  %s1821_s18 = scalar_lea.vmem [#allocation10], %s1248_s29 }
  0x6c   : > { %v1737_v17 = vld [vmem:[#allocation2 + $0x3] sm:$0xff]  ;;  %v265_v20 = vadd.f32 %v263_v14, %v258_v9  ;;  %v302_v25 = vstv %s1714_s27  ;;  %v279_v29 = vmul.f32 %v278_v16, %v1734_v15  ;;  %v266_v36 = vadd.f32 %v264_v27, %v258_v9  ;;  %v1766_v38 = vld [vmem:[#allocation2 + $0xb] sm:$0xff]  ;;  %s1803_s28 = sld [smem:[#allocation8 + $0x182]]  ;;  %s1830_s6 = sld [smem:[#allocation8 + $0x3]] }
  0x6d   : > { %v1745_v22 = vld [vmem:[#allocation2 + $0x4] sm:$0xff]  ;;  %v287_v30 = vmul.f32 %v286_v18, %v1737_v17  ;;  %v310_v32 = vstv %s1716_s20  ;;  %v1768_v39 = vld [vmem:[#allocation2 + $0xc] sm:$0xff]  ;;  %v280_v46 = vmul.f32 %v278_v16, %v1761_v33  ;;  %v288_v50 = vmul.f32 %v286_v18, %v1766_v38  ;;  %s1805_s27 = sld [smem:[#allocation8 + $0x202]]  ;;  %s1875_s29 = sld [smem:[#allocation8 + $0x84]] }
  0x6e   : > { %v1748_v24 = vld [vmem:[#allocation2 + $0x5] sm:$0xff]  ;;  %v273_v28 = vadd.f32 %v271_v21, %v265_v20  ;;  %v295_v34 = vmul.f32 %v294_v23, %v1745_v22  ;;  %v274_v45 = vadd.f32 %v272_v37, %v266_v36  ;;  %v1779_v47 = vld [vmem:[#allocation2 + $0xd] sm:$0xff]  ;;  %v296_v51 = vmul.f32 %v294_v23, %v1768_v39  ;;  %s1815_s20 = sld [smem:[#allocation8 + $0x282]]  ;;  %p2396_p12 = scmp.ne.s32.totalorder %s2389_s23, 0 }
  0x6f   : > { %v1758_v31 = vld [vmem:[#allocation2 + $0x6] sm:$0xff]  ;;  %v303_v35 = vmul.f32 %v302_v25, %v1748_v24  ;;  %v1788_v52 = vld [vmem:[#allocation2 + $0xe] sm:$0xff]  ;;  %v325_v55 = vadd.f32 %v323_v48, %v318_v41  ;;  %v331_v56 = vmul.f32 %v330_v43, %v1728_v12  ;;  %v346_v57 = vstv %s1742_s7  ;;  %s1817_s4 = sld [smem:[#allocation8 + $0x302]]  ;;  %s1834_s7 = sld [smem:[#allocation8 + $0x83]] }
  0x70   : > { %v281_v40 = vadd.f32 %v279_v29, %v273_v28  ;;  %v311_v44 = vmul.f32 %v310_v32, %v1758_v31  ;;  %v282_v54 = vadd.f32 %v280_v46, %v274_v45  ;;  %v304_v59 = vmul.f32 %v302_v25, %v1779_v47 }
  0x71   : > { %v354_v60 = vstv %s1753_s9  ;;  %v324_v61 = vmul.f32 %v322_v42, %v1740_v19  ;;  %v312_v63 = vmul.f32 %v310_v32, %v1788_v52  ;;  %v333_v0 = vadd.f32 %v331_v56, %v325_v55  ;;  %s1838_s9 = sld [smem:[#allocation8 + $0x103]] }
  0x72   : > { %v289_v49 = vadd.f32 %v287_v30, %v281_v40  ;;  %v290_v62 = vadd.f32 %v288_v50, %v282_v54  ;;  %v339_v1 = vmul.f32 %v338_v53, %v1734_v15  ;;  %v347_v3 = vmul.f32 %v346_v57, %v1737_v17 }
  0x73   : > { %v326_v4 = vadd.f32 %v324_v61, %v318_v41  ;;  %v332_v5 = vmul.f32 %v330_v43, %v1751_v26  ;;  %v355_v8 = vmul.f32 %v354_v60, %v1745_v22  ;;  %v362_v9 = vstv %s1770_s10  ;;  %s1847_s10 = sld [smem:[#allocation8 + $0x183]] }
  0x74   : > { %v297_v58 = vadd.f32 %v295_v34, %v289_v49  ;;  %v298_v6 = vadd.f32 %v296_v51, %v290_v62  ;;  %v341_v7 = vadd.f32 %v339_v1, %v333_v0  ;;  %v370_v13 = vstv %s1775_s11  ;;  %s1849_s11 = sld [smem:[#allocation8 + $0x203]]  ;;  %v1864_v0 = vld [vmem:[#allocation2 + $0x19] sm:$0xff] }
  0x75   : > { %v334_v14 = vadd.f32 %v332_v5, %v326_v4  ;;  %v340_v16 = vmul.f32 %v338_v53, %v1761_v33  ;;  %v379_v21 = vstv %s1782_s21  ;;  %v383_v23 = vstv %s1784_s22  ;;  %s1866_s21 = sld [smem:[#allocation8 + $0x283]]  ;;  %s1868_s22 = sld [smem:[#allocation9 + $0x4]]  ;;  %v1880_v4 = vld [vmem:[#allocation2 + $0x1a] sm:$0xff] }
  0x76   : > { %v305_v2 = vadd.f32 %v303_v35, %v297_v58  ;;  %v306_v18 = vadd.f32 %v304_v59, %v298_v6  ;;  %v349_v20 = vadd.f32 %v347_v3, %v341_v7  ;;  %v348_v27 = vmul.f32 %v346_v57, %v1766_v38  ;;  %v1855_v57 = vld [vmem:[#allocation2 + $0x18] sm:$0xff] }
  0x77   : > { %v342_v25 = vadd.f32 %v340_v16, %v334_v14  ;;  %v384_v28 = vmul.f32 %v383_v23, %v1725_v10  ;;  %v391_v29 = vstv %s1791_s25  ;;  %v363_v34 = vmul.f32 %v362_v9, %v1748_v24  ;;  %s1873_s25 = sld [smem:[#allocation8 + $0x4]]  ;;  %v1892_v14 = vld [vmem:[#allocation2 + $0x1b] sm:$0xff] }
  0x78   : > { %v313_v11 = vadd.f32 %v311_v44, %v305_v2  ;;  %v314_v30 = vadd.f32 %v312_v63, %v306_v18  ;;  %v357_v32 = vadd.f32 %v355_v8, %v349_v20  ;;  %v399_v35 = vstv %s1796_s30  ;;  %s1883_s30 = sld [smem:[#allocation8 + $0x303]]  ;;  %v1895_v16 = vld [vmem:[#allocation2 + $0x1c] sm:$0xff] }
  0x79   : > { %v350_v36 = vadd.f32 %v348_v27, %v342_v25  ;;  %v356_v37 = vmul.f32 %v354_v60, %v1768_v39  ;;  %v386_v40 = vadd.f32 %v384_v28, %v379_v21  ;;  %v392_v10 = vmul.f32 %v391_v29, %v1728_v12  ;;  %v1900_v25 = vld [vmem:[#allocation2 + $0x21] sm:$0xff] }
  0x7a   : > { %315 = vst.msk [vmem:[%s1821_s18] sm:$0xff] %vm248_vm1, %v313_v11  ;;  %316 = vst.msk [vmem:[%s1821_s18 + $0x8] sm:$0xff] %vm248_vm1, %v314_v30  ;;  %v365_v41 = vadd.f32 %v363_v34, %v357_v32  ;;  %v371_v42 = vmul.f32 %v370_v13, %v1758_v31  ;;  %v407_v43 = vstv %s1803_s28  ;;  %v415_v44 = vstv %s1805_s27  ;;  %s1889_s28 = sld [smem:[#allocation8 + $0x104]] }
  0x7b   : > { %v358_v45 = vadd.f32 %v356_v37, %v350_v36  ;;  %v364_v46 = vmul.f32 %v362_v9, %v1779_v47  ;;  %v394_v48 = vadd.f32 %v392_v10, %v386_v40  ;;  %v400_v49 = vmul.f32 %v399_v35, %v1734_v15  ;;  %v1887_v9 = vld [vmem:[#allocation2 + $0x20] sm:$0xff]  ;;  %s1902_s27 = sld [smem:[#allocation8 + $0x184]] }
  0x7c   : > { %v373_v12 = vadd.f32 %v371_v42, %v365_v41  ;;  %v372_v50 = vmul.f32 %v370_v13, %v1788_v52  ;;  %v385_v51 = vmul.f32 %v383_v23, %v1740_v19  ;;  %v408_v55 = vmul.f32 %v407_v43, %v1737_v17  ;;  %v1915_v36 = vld [vmem:[#allocation2 + $0x1d] sm:$0xff] }
  0x7d   : > { %v366_v53 = vadd.f32 %v364_v46, %v358_v45  ;;  %v402_v54 = vadd.f32 %v400_v49, %v394_v48  ;;  %v416_v56 = vmul.f32 %v415_v44, %v1745_v22  ;;  %v423_v15 = vstv %s1815_s20  ;;  %s1904_s20 = sld [smem:[#allocation8 + $0x204]]  ;;  %v1920_v42 = vld [vmem:[#allocation2 + $0x23] sm:$0xff] }
  0x7e   : > { %1142 = vst.msk [vmem:[%s1821_s18 + $0x10] sm:$0xff] %vm248_vm1, %v373_v12  ;;  %v431_v58 = vstv %s1817_s4  ;;  %v387_v59 = vadd.f32 %v385_v51, %v379_v21  ;;  %v393_v60 = vmul.f32 %v391_v29, %v1751_v26  ;;  %v440_v19 = vstv %s1828_s19  ;;  %s1924_s4 = sld [smem:[#allocation8 + $0x284]]  ;;  %s1926_s19 = sld [smem:[#allocation9 + $0x5]]  ;;  %v1928_v45 = vld [vmem:[#allocation2 + $0x1e] sm:$0xff] }
  0x7f   : > { %v374_v61 = vadd.f32 %v372_v50, %v366_v53  ;;  %v410_v62 = vadd.f32 %v408_v55, %v402_v54  ;;  %v445_v63 = vstv %s1830_s6  ;;  %v401_v22 = vmul.f32 %v399_v35, %v1761_v33  ;;  %v1911_v35 = vld [vmem:[#allocation2 + $0x22] sm:$0xff]  ;;  %s1933_s6 = sld [smem:[#allocation8 + $0x5]] }
  0x80   : > { %v395_v17 = vadd.f32 %v393_v60, %v387_v59  ;;  %v446_v1 = vmul.f32 %v445_v63, %v1855_v57  ;;  %v453_v2 = vstv %s1834_s7  ;;  %v424_v3 = vmul.f32 %v423_v15, %v1748_v24  ;;  %s1935_s7 = sld [smem:[#allocation8 + $0x85]]  ;;  %v1938_v54 = vld [vmem:[#allocation2 + $0x24] sm:$0xff] }
  0x81   : > { %1143 = vst.msk [vmem:[%s1821_s18 + $0x18] sm:$0xff] %vm248_vm1, %v374_v61  ;;  %v418_v26 = vadd.f32 %v416_v56, %v410_v62  ;;  %v461_v5 = vstv %s1838_s9  ;;  %v409_v6 = vmul.f32 %v407_v43, %v1766_v38  ;;  %v454_v8 = vmul.f32 %v453_v2, %v1864_v0  ;;  %s1941_s9 = sld [smem:[#allocation8 + $0x304]]  ;;  %v1946_v59 = vld [vmem:[#allocation2 + $0x26] sm:$0xff] }
  0x82   : > { %v403_v33 = vadd.f32 %v401_v22, %v395_v17  ;;  %v448_v7 = vadd.f32 %v446_v1, %v440_v19  ;;  %v432_v13 = vmul.f32 %v431_v58, %v1758_v31  ;;  %v469_v24 = vstv %s1847_s10  ;;  %s1949_s10 = sld [smem:[#allocation8 + $0x105]] }
  0x83   : > { %v426_v11 = vadd.f32 %v424_v3, %v418_v26  ;;  %v477_v18 = vstv %s1849_s11  ;;  %v417_v38 = vmul.f32 %v415_v44, %v1768_v39  ;;  %v462_v23 = vmul.f32 %v461_v5, %v1880_v4  ;;  %s1958_s11 = sld [smem:[#allocation8 + $0x185]] }
  0x84   : > { %v411_v20 = vadd.f32 %v409_v6, %v403_v33  ;;  %v456_v21 = vadd.f32 %v454_v8, %v448_v7  ;;  %v425_v27 = vmul.f32 %v423_v15, %v1779_v47  ;;  %v433_v28 = vmul.f32 %v431_v58, %v1788_v52  ;;  %v1944_v58 = vld [vmem:[#allocation2 + $0x25] sm:$0xff] }
  0x85   : > { %v434_v31 = vadd.f32 %v432_v13, %v426_v11  ;;  %v447_v29 = vmul.f32 %v445_v63, %v1887_v9  ;;  %v470_v32 = vmul.f32 %v469_v24, %v1892_v14  ;;  %v478_v34 = vmul.f32 %v477_v18, %v1895_v16 }
  0x86   : > { %v419_v39 = vadd.f32 %v417_v38, %v411_v20  ;;  %v464_v30 = vadd.f32 %v462_v23, %v456_v21  ;;  %v485_v47 = vstv %s1866_s21  ;;  %v455_v52 = vmul.f32 %v453_v2, %v1900_v25  ;;  %s1960_s21 = sld [smem:[#allocation8 + $0x205]] }
  0x87   : > { %1152 = vst.msk [vmem:[%s1821_s18 + $0x20] sm:$0xff] %vm248_vm1, %v434_v31  ;;  %v449_v37 = vadd.f32 %v447_v29, %v440_v19  ;;  %v502_v40 = vstv %s1868_s22  ;;  %v506_v43 = vstv %s1873_s25  ;;  %v514_v44 = vstv %s1875_s29  ;;  %s1974_s22 = sld [smem:[#allocation8 + $0x285]]  ;;  %s1976_s25 = sld [smem:[#allocation9 + $0x6]] }
  0x88   : > { %v427_v10 = vadd.f32 %v425_v27, %v419_v39  ;;  %v472_v41 = vadd.f32 %v470_v32, %v464_v30  ;;  %v493_v46 = vstv %s1883_s30  ;;  %v463_v49 = vmul.f32 %v461_v5, %v1911_v35  ;;  %s1981_s29 = sld [smem:[#allocation8 + $0x6]] }
  0x89   : > { %v457_v48 = vadd.f32 %v455_v52, %v449_v37  ;;  %v507_v12 = vmul.f32 %v506_v43, %v1855_v57  ;;  %v486_v53 = vmul.f32 %v485_v47, %v1915_v36  ;;  %v522_v55 = vstv %s1889_s28  ;;  %s1983_s30 = sld [smem:[#allocation8 + $0x86]]  ;;  %s1987_s28 = sld [smem:[#allocation8 + $0x305]] }
  0x8a   : > { %v435_v50 = vadd.f32 %v433_v28, %v427_v10  ;;  %v480_v51 = vadd.f32 %v478_v34, %v472_v41  ;;  %v471_v15 = vmul.f32 %v469_v24, %v1920_v42  ;;  %v515_v61 = vmul.f32 %v514_v44, %v1864_v0 }
  0x8b   : > { %v465_v56 = vadd.f32 %v463_v49, %v457_v48  ;;  %v509_v60 = vadd.f32 %v507_v12, %v502_v40  ;;  %v494_v19 = vmul.f32 %v493_v46, %v1928_v45  ;;  %v530_v63 = vstv %s1902_s27  ;;  %s1991_s27 = sld [smem:[#allocation8 + $0x106]] }
  0x8c   : > { %1153 = vst.msk [vmem:[%s1821_s18 + $0x28] sm:$0xff] %vm248_vm1, %v435_v50  ;;  %v488_v62 = vadd.f32 %v486_v53, %v480_v51  ;;  %v538_v17 = vstv %s1904_s20  ;;  %v479_v1 = vmul.f32 %v477_v18, %v1938_v54  ;;  %v523_v26 = vmul.f32 %v522_v55, %v1880_v4  ;;  %s2000_s20 = sld [smem:[#allocation8 + $0x186]] }
  0x8d   : > { %v473_v22 = vadd.f32 %v471_v15, %v465_v56  ;;  %v517_v2 = vadd.f32 %v515_v61, %v509_v60  ;;  %v487_v5 = vmul.f32 %v485_v47, %v1944_v58  ;;  %v495_v33 = vmul.f32 %v493_v46, %v1946_v59  ;;  %v2009_v61 = vld [vmem:[#allocation2 + $0x30] sm:$0xff] }
  0x8e   : > { %v496_v3 = vadd.f32 %v494_v19, %v488_v62  ;;  %v508_v6 = vmul.f32 %v506_v43, %v1887_v9  ;;  %v531_v11 = vmul.f32 %v530_v63, %v1892_v14  ;;  %v539_v13 = vmul.f32 %v538_v17, %v1895_v16 }
  0x8f   : > { %v481_v7 = vadd.f32 %v479_v1, %v473_v22  ;;  %v525_v8 = vadd.f32 %v523_v26, %v517_v2  ;;  %v546_v24 = vstv %s1924_s4  ;;  %v516_v20 = vmul.f32 %v514_v44, %v1900_v25  ;;  %s2002_s4 = sld [smem:[#allocation8 + $0x206]]  ;;  %v2017_v2 = vld [vmem:[#allocation2 + $0x31] sm:$0xff] }
  0x90   : > { %1162 = vst.msk [vmem:[%s1821_s18 + $0x30] sm:$0xff] %vm248_vm1, %v496_v3  ;;  %v510_v18 = vadd.f32 %v508_v6, %v502_v40  ;;  %v563_v38 = vstv %s1926_s19  ;;  %v567_v31 = vstv %s1933_s6  ;;  %v575_v27 = vstv %s1935_s7  ;;  %s2020_s19 = sld [smem:[#allocation8 + $0x286]]  ;;  %s2022_s6 = sld [smem:[#allocation9 + $0x7]] }
  0x91   : > { %v489_v21 = vadd.f32 %v487_v5, %v481_v7  ;;  %v533_v23 = vadd.f32 %v531_v11, %v525_v8  ;;  %v554_v28 = vstv %s1941_s9  ;;  %v524_v39 = vmul.f32 %v522_v55, %v1911_v35  ;;  %s2027_s7 = sld [smem:[#allocation8 + $0x7]]  ;;  %v2032_v7 = vld [vmem:[#allocation2 + $0x32] sm:$0xff] }
  0x92   : > { %v518_v29 = vadd.f32 %v516_v20, %v510_v18  ;;  %v568_v30 = vmul.f32 %v567_v31, %v1855_v57  ;;  %v547_v47 = vmul.f32 %v546_v24, %v1915_v36  ;;  %v583_v37 = vstv %s1949_s10  ;;  %s2029_s9 = sld [smem:[#allocation8 + $0x87]]  ;;  %s2035_s10 = sld [smem:[#allocation8 + $0x306]]  ;;  %v2039_v18 = vld [vmem:[#allocation2 + $0x38] sm:$0xff] }
  0x93   : > { %v497_v32 = vadd.f32 %v495_v33, %v489_v21  ;;  %v541_v34 = vadd.f32 %v539_v13, %v533_v23  ;;  %v532_v40 = vmul.f32 %v530_v63, %v1920_v42  ;;  %v576_v41 = vmul.f32 %v575_v27, %v1864_v0  ;;  %v2049_v23 = vld [vmem:[#allocation2 + $0x34] sm:$0xff] }
  0x94   : > { %v526_v52 = vadd.f32 %v524_v39, %v518_v29  ;;  %v570_v10 = vadd.f32 %v568_v30, %v563_v38  ;;  %v555_v43 = vmul.f32 %v554_v28, %v1928_v45  ;;  %v591_v44 = vstv %s1958_s11  ;;  %s2041_s11 = sld [smem:[#allocation8 + $0x107]]  ;;  %v2054_v39 = vld [vmem:[#allocation2 + $0x39] sm:$0xff] }
  0x95   : > { %1163 = vst.msk [vmem:[%s1821_s18 + $0x38] sm:$0xff] %vm248_vm1, %v497_v32  ;;  %v549_v57 = vadd.f32 %v547_v47, %v541_v34  ;;  %v599_v46 = vstv %s1960_s21  ;;  %v540_v49 = vmul.f32 %v538_v17, %v1938_v54  ;;  %v584_v50 = vmul.f32 %v583_v37, %v1880_v4  ;;  %s2056_s21 = sld [smem:[#allocation8 + $0x187]] }
  0x96   : > { %v534_v48 = vadd.f32 %v532_v40, %v526_v52  ;;  %v578_v12 = vadd.f32 %v576_v41, %v570_v10  ;;  %v548_v51 = vmul.f32 %v546_v24, %v1944_v58  ;;  %v556_v53 = vmul.f32 %v554_v28, %v1946_v59  ;;  %v2065_v40 = vld [vmem:[#allocation2 + $0x3a] sm:$0xff] }
  0x97   : > { %v557_v0 = vadd.f32 %v555_v43, %v549_v57  ;;  %v569_v55 = vmul.f32 %v567_v31, %v1887_v9  ;;  %v592_v60 = vmul.f32 %v591_v44, %v1892_v14  ;;  %v600_v4 = vmul.f32 %v599_v46, %v1895_v16  ;;  %v2069_v10 = vld [vmem:[#allocation2 + $0x35] sm:$0xff] }
  0x98   : > { %v542_v56 = vadd.f32 %v540_v49, %v534_v48  ;;  %v586_v15 = vadd.f32 %v584_v50, %v578_v12  ;;  %v607_v62 = vstv %s1974_s22  ;;  %v577_v63 = vmul.f32 %v575_v27, %v1900_v25  ;;  %s2058_s22 = sld [smem:[#allocation8 + $0x207]]  ;;  %v2082_v12 = vld [vmem:[#allocation2 + $0x36] sm:$0xff] }
  0x99   : > { %1172 = vst.msk [vmem:[%s1821_s18 + $0x40] sm:$0xff] %vm248_vm1, %v557_v0  ;;  %v571_v19 = vadd.f32 %v569_v55, %v563_v38  ;;  %v624_v17 = vstv %s1976_s25  ;;  %v629_v9 = vstv %s1981_s29  ;;  %v637_v26 = vstv %s1983_s30  ;;  %v2046_v38 = vld [vmem:[#allocation2 + $0x33] sm:$0xff]  ;;  %s2078_s25 = sld [smem:[#allocation8 + $0x287]]  ;;  %s2080_s29 = sld [smem:[#allocation9 + $0x8]] }
  0x9a   : > { %v550_v22 = vadd.f32 %v548_v51, %v542_v56  ;;  %v594_v1 = vadd.f32 %v592_v60, %v586_v15  ;;  %v615_v14 = vstv %s1987_s28  ;;  %v585_v3 = vmul.f32 %v583_v37, %v1911_v35  ;;  %s2087_s30 = sld [smem:[#allocation8 + $0x8]]  ;;  %v2092_v60 = vld [vmem:[#allocation2 + $0x3c] sm:$0xff] }
  0x9b   : > { %v579_v16 = vadd.f32 %v577_v63, %v571_v19  ;;  %v630_v5 = vmul.f32 %v629_v9, %v2009_v61  ;;  %v608_v6 = vmul.f32 %v607_v62, %v1915_v36  ;;  %v645_v8 = vstv %s1991_s27  ;;  %s2089_s28 = sld [smem:[#allocation8 + $0x88]]  ;;  %s2095_s27 = sld [smem:[#allocation8 + $0x307]]  ;;  %v2098_v63 = vld [vmem:[#allocation2 + $0x3d] sm:$0xff] }
  0x9c   : > { %v558_v25 = vadd.f32 %v556_v53, %v550_v22  ;;  %v602_v33 = vadd.f32 %v600_v4, %v594_v1  ;;  %v593_v35 = vmul.f32 %v591_v44, %v1920_v42  ;;  %v638_v24 = vmul.f32 %v637_v26, %v2017_v2 }
  0x9d   : > { %v587_v11 = vadd.f32 %v585_v3, %v579_v16  ;;  %v632_v13 = vadd.f32 %v630_v5, %v624_v17  ;;  %v616_v36 = vmul.f32 %v615_v14, %v1928_v45  ;;  %v653_v21 = vstv %s2000_s20  ;;  %s2103_s20 = sld [smem:[#allocation8 + $0x108]] }
  0x9e   : > { %1173 = vst.msk [vmem:[%s1821_s18 + $0x48] sm:$0xff] %vm248_vm1, %v558_v25  ;;  %v610_v20 = vadd.f32 %v608_v6, %v602_v33  ;;  %v661_v31 = vstv %s2002_s4  ;;  %v601_v42 = vmul.f32 %v599_v46, %v1938_v54  ;;  %v646_v29 = vmul.f32 %v645_v8, %v2032_v7  ;;  %v2074_v46 = vld [vmem:[#allocation2 + $0x3b] sm:$0xff]  ;;  %s2112_s4 = sld [smem:[#allocation8 + $0x188]] }
  0x9f   : > { %v595_v27 = vadd.f32 %v593_v35, %v587_v11  ;;  %v640_v28 = vadd.f32 %v638_v24, %v632_v13  ;;  %v609_v30 = vmul.f32 %v607_v62, %v1944_v58  ;;  %v617_v32 = vmul.f32 %v615_v14, %v1946_v59 }
  0xa0   : > { %v618_v45 = vadd.f32 %v616_v36, %v610_v20  ;;  %v631_v34 = vmul.f32 %v629_v9, %v2039_v18  ;;  %v654_v37 = vmul.f32 %v653_v21, %v2046_v38  ;;  %v662_v52 = vmul.f32 %v661_v31, %v2049_v23 }
  0xa1   : > { %v603_v54 = vadd.f32 %v601_v42, %v595_v27  ;;  %v648_v47 = vadd.f32 %v646_v29, %v640_v28  ;;  %v669_v58 = vstv %s2020_s19  ;;  %v639_v59 = vmul.f32 %v637_v26, %v2054_v39  ;;  %s2114_s19 = sld [smem:[#allocation8 + $0x208]] }
  0xa2   : > { %1182 = vst.msk [vmem:[%s1821_s18 + $0x50] sm:$0xff] %vm248_vm1, %v618_v45  ;;  %v633_v41 = vadd.f32 %v631_v34, %v624_v17  ;;  %v686_v57 = vstv %s2022_s6  ;;  %v690_v48 = vstv %s2027_s7  ;;  %v698_v49 = vstv %s2029_s9  ;;  %v2100_v17 = vld [vmem:[#allocation2 + $0x3e] sm:$0xff]  ;;  %s2128_s6 = sld [smem:[#allocation8 + $0x288]]  ;;  %s2130_s7 = sld [smem:[#allocation9 + $0x9]] }
  0xa3   : > { %v611_v43 = vadd.f32 %v609_v30, %v603_v54  ;;  %v656_v44 = vadd.f32 %v654_v37, %v648_v47  ;;  %v677_v50 = vstv %s2035_s10  ;;  %v647_v51 = vmul.f32 %v645_v8, %v2065_v40  ;;  %s2135_s9 = sld [smem:[#allocation8 + $0x9]] }
  0xa4   : > { %v641_v0 = vadd.f32 %v639_v59, %v633_v41  ;;  %v691_v53 = vmul.f32 %v690_v48, %v2009_v61  ;;  %v670_v15 = vmul.f32 %v669_v58, %v2069_v10  ;;  %v706_v4 = vstv %s2041_s11  ;;  %s2137_s10 = sld [smem:[#allocation8 + $0x89]]  ;;  %s2141_s11 = sld [smem:[#allocation8 + $0x308]] }
  0xa5   : > { %v619_v55 = vadd.f32 %v617_v32, %v611_v43  ;;  %v664_v56 = vadd.f32 %v662_v52, %v656_v44  ;;  %v655_v19 = vmul.f32 %v653_v21, %v2074_v46  ;;  %v699_v1 = vmul.f32 %v698_v49, %v2017_v2 }
  0xa6   : > { %v649_v62 = vadd.f32 %v647_v51, %v641_v0  ;;  %v693_v22 = vadd.f32 %v691_v53, %v686_v57  ;;  %v678_v26 = vmul.f32 %v677_v50, %v2082_v12  ;;  %v714_v14 = vstv %s2056_s21  ;;  %s2145_s21 = sld [smem:[#allocation8 + $0x109]] }
  0xa7   : > { %1183 = vst.msk [vmem:[%s1821_s18 + $0x58] sm:$0xff] %vm248_vm1, %v619_v55  ;;  %v672_v9 = vadd.f32 %v670_v15, %v664_v56  ;;  %v722_v16 = vstv %s2058_s22  ;;  %v663_v5 = vmul.f32 %v661_v31, %v2092_v60  ;;  %v707_v33 = vmul.f32 %v706_v4, %v2032_v7  ;;  %s2154_s22 = sld [smem:[#allocation8 + $0x189]] }
  0xa8   : > { %v657_v3 = vadd.f32 %v655_v19, %v649_v62  ;;  %v701_v25 = vadd.f32 %v699_v1, %v693_v22  ;;  %v671_v8 = vmul.f32 %v669_v58, %v2098_v63  ;;  %v679_v11 = vmul.f32 %v677_v50, %v2100_v17  ;;  %v2163_v1 = vld [vmem:[#allocation2 + $0x48] sm:$0xff] }
  0xa9   : > { %v680_v6 = vadd.f32 %v678_v26, %v672_v9  ;;  %v692_v35 = vmul.f32 %v690_v48, %v2039_v18  ;;  %v715_v20 = vmul.f32 %v714_v14, %v2046_v38  ;;  %v723_v36 = vmul.f32 %v722_v16, %v2049_v23 }
  0xaa   : > { %v665_v13 = vadd.f32 %v663_v5, %v657_v3  ;;  %v709_v24 = vadd.f32 %v707_v33, %v701_v25  ;;  %v730_v21 = vstv %s2078_s25  ;;  %v700_v27 = vmul.f32 %v698_v49, %v2054_v39  ;;  %s2156_s25 = sld [smem:[#allocation8 + $0x209]]  ;;  %v2171_v25 = vld [vmem:[#allocation2 + $0x49] sm:$0xff] }
  0xab   : > { %1192 = vst.msk [vmem:[%s1821_s18 + $0x60] sm:$0xff] %vm248_vm1, %v680_v6  ;;  %v694_v31 = vadd.f32 %v692_v35, %v686_v57  ;;  %v747_v42 = vstv %s2080_s29  ;;  %v751_v45 = vstv %s2087_s30  ;;  %v759_v30 = vstv %s2089_s28  ;;  %s2174_s29 = sld [smem:[#allocation8 + $0x289]]  ;;  %s2176_s30 = sld [smem:[#allocation9 + $0xa]] }
  0xac   : > { %v673_v28 = vadd.f32 %v671_v8, %v665_v13  ;;  %v717_v29 = vadd.f32 %v715_v20, %v709_v24  ;;  %v738_v32 = vstv %s2095_s27  ;;  %v708_v54 = vmul.f32 %v706_v4, %v2065_v40  ;;  %s2181_s28 = sld [smem:[#allocation8 + $0xa]]  ;;  %v2186_v13 = vld [vmem:[#allocation2 + $0x4a] sm:$0xff] }
  0xad   : > { %v702_v34 = vadd.f32 %v700_v27, %v694_v31  ;;  %v752_v47 = vmul.f32 %v751_v45, %v2009_v61  ;;  %v731_v58 = vmul.f32 %v730_v21, %v2069_v10  ;;  %v767_v41 = vstv %s2103_s20  ;;  %s2183_s27 = sld [smem:[#allocation8 + $0x8a]]  ;;  %s2189_s20 = sld [smem:[#allocation8 + $0x309]]  ;;  %v2193_v31 = vld [vmem:[#allocation2 + $0x50] sm:$0xff] }
  0xae   : > { %v681_v37 = vadd.f32 %v679_v11, %v673_v28  ;;  %v725_v52 = vadd.f32 %v723_v36, %v717_v29  ;;  %v716_v57 = vmul.f32 %v714_v14, %v2074_v46  ;;  %v760_v44 = vmul.f32 %v759_v30, %v2017_v2  ;;  %v2203_v29 = vld [vmem:[#allocation2 + $0x4c] sm:$0xff] }
  0xaf   : > { %v710_v59 = vadd.f32 %v708_v54, %v702_v34  ;;  %v754_v43 = vadd.f32 %v752_v47, %v747_v42  ;;  %v739_v48 = vmul.f32 %v738_v32, %v2082_v12  ;;  %v775_v49 = vstv %s2112_s4  ;;  %s2195_s4 = sld [smem:[#allocation8 + $0x10a]]  ;;  %v2208_v54 = vld [vmem:[#allocation2 + $0x51] sm:$0xff] }
  0xb0   : > { %1193 = vst.msk [vmem:[%s1821_s18 + $0x68] sm:$0xff] %vm248_vm1, %v681_v37  ;;  %v733_v61 = vadd.f32 %v731_v58, %v725_v52  ;;  %v783_v50 = vstv %s2114_s19  ;;  %v724_v51 = vmul.f32 %v722_v16, %v2092_v60  ;;  %v768_v55 = vmul.f32 %v767_v41, %v2032_v7  ;;  %s2210_s19 = sld [smem:[#allocation8 + $0x18a]] }
  0xb1   : > { %v718_v0 = vadd.f32 %v716_v57, %v710_v59  ;;  %v762_v53 = vadd.f32 %v760_v44, %v754_v43  ;;  %v732_v56 = vmul.f32 %v730_v21, %v2098_v63  ;;  %v740_v15 = vmul.f32 %v738_v32, %v2100_v17  ;;  %v2219_v57 = vld [vmem:[#allocation2 + $0x52] sm:$0xff] }
  0xb2   : > { %v741_v2 = vadd.f32 %v739_v48, %v733_v61  ;;  %v753_v4 = vmul.f32 %v751_v45, %v2039_v18  ;;  %v776_v22 = vmul.f32 %v775_v49, %v2046_v38  ;;  %v784_v7 = vmul.f32 %v783_v50, %v2049_v23  ;;  %v2223_v43 = vld [vmem:[#allocation2 + $0x4d] sm:$0xff] }
  0xb3   : > { %v726_v62 = vadd.f32 %v724_v51, %v718_v0  ;;  %v770_v19 = vadd.f32 %v768_v55, %v762_v53  ;;  %v791_v9 = vstv %s2128_s6  ;;  %v761_v14 = vmul.f32 %v759_v30, %v2054_v39  ;;  %s2212_s6 = sld [smem:[#allocation8 + $0x20a]]  ;;  %v2236_v53 = vld [vmem:[#allocation2 + $0x4e] sm:$0xff] }
  0xb4   : > { %1202 = vst.msk [vmem:[%s1821_s18 + $0x70] sm:$0xff] %vm248_vm1, %v741_v2  ;;  %v755_v26 = vadd.f32 %v753_v4, %v747_v42  ;;  %v808_v16 = vstv %s2130_s7  ;;  %v813_v18 = vstv %s2135_s9  ;;  %v821_v33 = vstv %s2137_s10  ;;  %v2200_v42 = vld [vmem:[#allocation2 + $0x4b] sm:$0xff]  ;;  %s2232_s7 = sld [smem:[#allocation8 + $0x28a]]  ;;  %s2234_s9 = sld [smem:[#allocation9 + $0xb]] }
  0xb5   : > { %v734_v3 = vadd.f32 %v732_v56, %v726_v62  ;;  %v778_v5 = vadd.f32 %v776_v22, %v770_v19  ;;  %v799_v38 = vstv %s2141_s11  ;;  %v769_v6 = vmul.f32 %v767_v41, %v2065_v40  ;;  %s2241_s10 = sld [smem:[#allocation8 + $0xb]]  ;;  %v2246_v22 = vld [vmem:[#allocation2 + $0x54] sm:$0xff] }
  0xb6   : > { %v763_v23 = vadd.f32 %v761_v14, %v755_v26  ;;  %v814_v8 = vmul.f32 %v813_v18, %v2163_v1  ;;  %v792_v35 = vmul.f32 %v791_v9, %v2069_v10  ;;  %v829_v24 = vstv %s2145_s21  ;;  %s2243_s11 = sld [smem:[#allocation8 + $0x8b]]  ;;  %s2249_s21 = sld [smem:[#allocation8 + $0x30a]]  ;;  %v2252_v14 = vld [vmem:[#allocation2 + $0x55] sm:$0xff] }
  0xb7   : > { %v742_v39 = vadd.f32 %v740_v15, %v734_v3  ;;  %v786_v11 = vadd.f32 %v784_v7, %v778_v5  ;;  %v777_v40 = vmul.f32 %v775_v49, %v2074_v46  ;;  %v822_v21 = vmul.f32 %v821_v33, %v2171_v25 }
  0xb8   : > { %v771_v20 = vadd.f32 %v769_v6, %v763_v23  ;;  %v816_v36 = vadd.f32 %v814_v8, %v808_v16  ;;  %v800_v10 = vmul.f32 %v799_v38, %v2082_v12  ;;  %v837_v28 = vstv %s2154_s22  ;;  %s2257_s22 = sld [smem:[#allocation8 + $0x10b]] }
  0xb9   : > { %1203 = vst.msk [vmem:[%s1821_s18 + $0x78] sm:$0xff] %vm248_vm1, %v742_v39  ;;  %v794_v27 = vadd.f32 %v792_v35, %v786_v11  ;;  %v845_v45 = vstv %s2156_s25  ;;  %v785_v46 = vmul.f32 %v783_v50, %v2092_v60  ;;  %v830_v34 = vmul.f32 %v829_v24, %v2186_v13  ;;  %v2228_v50 = vld [vmem:[#allocation2 + $0x53] sm:$0xff]  ;;  %s2266_s25 = sld [smem:[#allocation8 + $0x18b]] }
  0xba   : > { %v779_v30 = vadd.f32 %v777_v40, %v771_v20  ;;  %v824_v32 = vadd.f32 %v822_v21, %v816_v36  ;;  %v793_v47 = vmul.f32 %v791_v9, %v2098_v63  ;;  %v801_v37 = vmul.f32 %v799_v38, %v2100_v17 }
  0xbb   : > { %v802_v12 = vadd.f32 %v800_v10, %v794_v27  ;;  %v815_v52 = vmul.f32 %v813_v18, %v2193_v31  ;;  %v838_v41 = vmul.f32 %v837_v28, %v2200_v42  ;;  %v846_v59 = vmul.f32 %v845_v45, %v2203_v29 }
  0xbc   : > { %v787_v60 = vadd.f32 %v785_v46, %v779_v30  ;;  %v832_v58 = vadd.f32 %v830_v34, %v824_v32  ;;  %v853_v63 = vstv %s2174_s29  ;;  %v823_v17 = vmul.f32 %v821_v33, %v2208_v54  ;;  %s2273_s29 = sld [smem:[#allocation8 + $0x20b]] }
  0xbd   : > { %1212 = vst.msk [vmem:[%s1821_s18 + $0x80] sm:$0xff] %vm248_vm1, %v802_v12  ;;  %v817_v44 = vadd.f32 %v815_v52, %v808_v16  ;;  %v870_v61 = vstv %s2176_s30  ;;  %v874_v0 = vstv %s2181_s28  ;;  %v882_v51 = vstv %s2183_s27  ;;  %v2254_v16 = vld [vmem:[#allocation2 + $0x56] sm:$0xff]  ;;  %s2282_s30 = sld [smem:[#allocation8 + $0x28b]]  ;;  %s1249_s27 = smul.u32 3072, %s1478_s15 }
  0xbe   : > { %v795_v48 = vadd.f32 %v793_v47, %v787_v60  ;;  %v840_v49 = vadd.f32 %v838_v41, %v832_v58  ;;  %v861_v55 = vstv %s2189_s20  ;;  %v831_v56 = vmul.f32 %v829_v24, %v2219_v57  ;;  %s2289_s28 = sld [smem:[#allocation8 + $0x30b]]  ;;  %s1006_s20 = sshll.u32 %s1821_s18, 4  ;;  %s2328_s20 = int_to_ptr.vmem [resolvable:$true] %s1006_s20 }
  0xbf   : > { %v825_v2 = vadd.f32 %v823_v17, %v817_v44  ;;  %v875_v15 = vmul.f32 %v874_v0, %v2163_v1  ;;  %v854_v19 = vmul.f32 %v853_v63, %v2223_v43  ;;  %v890_v7 = vstv %s2195_s4  ;;  %s992_s15 = scalar_lea.sflag [#allocation5], %s1668_s8 }
  0xc0   : > { %v803_v4 = vadd.f32 %v801_v37, %v795_v48  ;;  %v848_v62 = vadd.f32 %v846_v59, %v840_v49  ;;  %v839_v26 = vmul.f32 %v837_v28, %v2228_v50  ;;  %v883_v5 = vmul.f32 %v882_v51, %v2171_v25 }
  0xc1   : > { %v833_v9 = vadd.f32 %v831_v56, %v825_v2  ;;  %v877_v3 = vadd.f32 %v875_v15, %v870_v61  ;;  %v862_v33 = vmul.f32 %v861_v55, %v2236_v53  ;;  %v898_v38 = vstv %s2210_s19 }
  0xc2   : > { %1213 = vst.msk [vmem:[%s1821_s18 + $0x88] sm:$0xff] %vm248_vm1, %v803_v4  ;;  %v856_v18 = vadd.f32 %v854_v19, %v848_v62  ;;  %v906_v23 = vstv %s2212_s6  ;;  %v847_v8 = vmul.f32 %v845_v45, %v2246_v22  ;;  %v891_v11 = vmul.f32 %v890_v7, %v2186_v13  ;;  %s2326_s6 = scalar_lea.hbm %s2382_s3, %s1249_s27 }
  0xc3   : > { %v841_v6 = vadd.f32 %v839_v26, %v833_v9  ;;  %v885_v39 = vadd.f32 %v883_v5, %v877_v3  ;;  %v855_v24 = vmul.f32 %v853_v63, %v2252_v14  ;;  %v863_v20 = vmul.f32 %v861_v55, %v2254_v16 }
  0xc4   : > { %v864_v35 = vadd.f32 %v862_v33, %v856_v18  ;;  %v876_v40 = vmul.f32 %v874_v0, %v2193_v31  ;;  %v899_v27 = vmul.f32 %v898_v38, %v2200_v42  ;;  %v907_v10 = vmul.f32 %v906_v23, %v2203_v29 }
  0xc5   : > { %v849_v36 = vadd.f32 %v847_v8, %v841_v6  ;;  %v893_v21 = vadd.f32 %v891_v11, %v885_v39  ;;  %v914_v28 = vstv %s2232_s7  ;;  %v884_v30 = vmul.f32 %v882_v51, %v2208_v54  ;;  %s1396_s7 = scalar_lea.vmem %s2328_s20, 3072 }
  0xc6   : > { %1222 = vst.msk [vmem:[%s1821_s18 + $0x90] sm:$0xff] %vm248_vm1, %v864_v35  ;;  %v878_v45 = vadd.f32 %v876_v40, %v870_v61  ;;  %v931_v46 = vstv %s2234_s9  ;;  %v935_v12 = vstv %s2241_s10  ;;  %v943_v47 = vstv %s2243_s11  ;;  %p1397_p13 = scmp.ne.s32.totalorder %s2328_s20, %s1396_s7  ;;  %s1494_s9 = smov [#allocation10]  }
  0xc7   : > { %v857_v32 = vadd.f32 %v855_v24, %v849_v36  ;;  %v901_v34 = vadd.f32 %v899_v27, %v893_v21  ;;  %v922_v37 = vstv %s2249_s21  ;;  %v892_v60 = vmul.f32 %v890_v7, %v2219_v57  ;;  %s1400_s10 = sshll.u32 %s1494_s9, 4  ;;  %s1401_s10 = int_to_ptr.vmem [resolvable:$false] %s1400_s10 }
  0xc8   : > { %v886_v52 = vadd.f32 %v884_v30, %v878_v45  ;;  %v936_v58 = vmul.f32 %v935_v12, %v2163_v1  ;;  %v915_v63 = vmul.f32 %v914_v28, %v2223_v43  ;;  %v951_v44 = vstv %s2257_s22  ;;  %p1398_p0 = pnand %p1397_p13, %p2396_p12  ;;  %s1402_s11 = scalar_lea.vmem %s1401_s10, 6144 }
  0xc9   : > { %v865_v41 = vadd.f32 %v863_v20, %v857_v32  ;;  %v909_v59 = vadd.f32 %v907_v10, %v901_v34  ;;  %v900_v61 = vmul.f32 %v898_v38, %v2228_v50  ;;  %v944_v49 = vmul.f32 %v943_v47, %v2171_v25  ;;  %p1403_p10 = scmp.lt.s32.totalorder %s2328_s20, %s1401_s10  ;;  %p1404_p11 = scmp.lt.s32.totalorder %s1402_s11, %s1396_s7 }
  0xca   : > { %v894_v17 = vadd.f32 %v892_v60, %v886_v52  ;;  %v938_v48 = vadd.f32 %v936_v58, %v931_v46  ;;  %v923_v1 = vmul.f32 %v922_v37, %v2236_v53  ;;  %v959_v51 = vstv %s2266_s25  ;;  %p1399_p5 = pneg %p1398_p0 }
  0xcb   : > { %1223 = vst.msk [vmem:[%s1821_s18 + $0x98] sm:$0xff] %vm248_vm1, %v865_v41  ;;  %v917_v0 = vadd.f32 %v915_v63, %v909_v59  ;;  %v908_v2 = vmul.f32 %v906_v23, %v2246_v22  ;;  %v952_v15 = vmul.f32 %v951_v44, %v2186_v13  ;;  %v967_v62 = vstv %s2273_s29  ;;  %p1405_p3 = por %p1404_p11, %p1403_p10 }
  0xcc   : > { %v902_v55 = vadd.f32 %v900_v61, %v894_v17  ;;  %v946_v56 = vadd.f32 %v944_v49, %v938_v48  ;;  %v937_v19 = vmul.f32 %v935_v12, %v2193_v31  ;;  %v916_v7 = vmul.f32 %v914_v28, %v2252_v14 }
  0xcd   : > { %v925_v4 = vadd.f32 %v923_v1, %v917_v0  ;;  %v960_v26 = vmul.f32 %v959_v51, %v2200_v42  ;;  %v975_v3 = vstv %s2282_s30  ;;  %v945_v18 = vmul.f32 %v943_v47, %v2208_v54  ;;  %p1406_p7 = pnand %p1405_p3, %p1399_p5 }
  0xce   : > { %v910_v25 = vadd.f32 %v908_v2, %v902_v55  ;;  %v954_v9 = vadd.f32 %v952_v15, %v946_v56  ;;  %v939_v5 = vadd.f32 %v937_v19, %v931_v46  ;;  %v924_v13 = vmul.f32 %v922_v37, %v2254_v16 }
  0xcf   : > { %1232 = vst.msk [vmem:[%s1821_s18 + $0xa0] sm:$0xff] %vm248_vm1, %v925_v4  ;;  %v968_v31 = vmul.f32 %v967_v62, %v2203_v29  ;;  %v983_v23 = vstv %s2289_s28  ;;  %v953_v8 = vmul.f32 %v951_v44, %v2219_v57  ;;  %v976_v11 = vmul.f32 %v975_v3, %v2223_v43 }
  0xd0   : > { %v918_v33 = vadd.f32 %v916_v7, %v910_v25  ;;  %v962_v38 = vadd.f32 %v960_v26, %v954_v9  ;;  %v947_v6 = vadd.f32 %v945_v18, %v939_v5  ;;  %v961_v54 = vmul.f32 %v959_v51, %v2228_v50 }
  0xd1   : > { %v984_v29 = vmul.f32 %v983_v23, %v2236_v53  ;;  %v969_v40 = vmul.f32 %v967_v62, %v2246_v22  ;;  %v977_v21 = vmul.f32 %v975_v3, %v2252_v14  ;;  %v985_v50 = vmul.f32 %v983_v23, %v2254_v16 }
  0xd2   : > { %v926_v42 = vadd.f32 %v924_v13, %v918_v33  ;;  %v970_v39 = vadd.f32 %v968_v31, %v962_v38  ;;  %v955_v35 = vadd.f32 %v953_v8, %v947_v6 }
  0xd4   : > { %1233 = vst.msk [vmem:[%s1821_s18 + $0xa8] sm:$0xff] %vm248_vm1, %v926_v42  ;;  %v978_v24 = vadd.f32 %v976_v11, %v970_v39  ;;  %v963_v20 = vadd.f32 %v961_v54, %v955_v35 }
  0xd6   : > { %v986_v57 = vadd.f32 %v984_v29, %v978_v24  ;;  %v971_v36 = vadd.f32 %v969_v40, %v963_v20 }
  0xd8   : > { %1242 = vst.msk [vmem:[%s1821_s18 + $0xb0] sm:$0xff] %vm248_vm1, %v986_v57  ;;  %v979_v43 = vadd.f32 %v977_v21, %v971_v36 }
  0xda   : > { %v987_v53 = vadd.f32 %v985_v50, %v979_v43 }
  0xdc   : > { %1243 = vst.msk [vmem:[%s1821_s18 + $0xb8] sm:$0xff] %vm248_vm1, %v987_v53 }
  0xdd   : > { %1409 = shalt.err (!%p1406_p7)
}
  0xde   : > { %s1410_s18 = scalar_lea.hbm %s2326_s6, 3072  ;;  %s1414_s25 = scalar_lea.hbm %s2382_s3, 6144 }
  0xdf   : > { %p1411_p9 = scmp.ne.s32.totalorder %s2326_s6, %s1410_s18  ;;  %p1415_p1 = scmp.lt.u32.totalorder %s2326_s6, %s2382_s3 }
  0xe0   : > { %p1416_p8 = scmp.lt.u32.totalorder %s1414_s25, %s1410_s18  ;;  %p1418_p13 = scmp.lt.u32.totalorder %s1410_s18, %s2326_s6 }
  0xe1   : > { %p1412_p2 = pnand %p1411_p9, %p2396_p12 }
  0xe2   : > { %p1417_p4 = por %p1416_p8, %p1415_p1 }
  0xe3   : > { %p1413_p6 = pneg %p1412_p2 }
  0xe4   : > { %p1419_p0 = por %p1418_p13, %p1417_p4 }
  0xe6   : > { %p1420_p5 = pnand %p1419_p0, %p1413_p6 }
  0xe8   : > { %1423 = shalt.err (!%p1420_p5)
}
  0xe9   : > { %s1495_s28 = smov 128   ;;  %s1496_s27 = smov 8  }
  0xea   : > { %1260 = dma.vmem_to_hbm [thread:$0]  (%p2396_p12), %s2328_s20, 3072, %s2326_s6, %s992_s15, %s1495_s28, %s1495_s28, %s1496_s27  }
  0xeb PF: > { %s1021_s4 = sand.u32 1, %s1466_s12   ;;  %p2397_p10 = scmp.ne.s32.totalorder %s2390_s24, 0 }
  0xec   : > { %p2398_p11 = scmp.ge.s32.totalorder %s1486_s17, 2  ;;  %s1022_s19 = scalar_lea.sflag [#allocation5], %s1021_s4 }
  0xee   : > { %p1274_p3 = pnand %p2398_p11, %p2397_p10 }
  0xf0   : > { %1461 = dma.done.wait (!%p1274_p3), %s1022_s19, 3072  }
  0xf1   : > { %1463 = vsyncadd (!%p1274_p3), %s1022_s19, 4294964224  ;;  %s21_s17 = sadd.s32 1, %s1486_s17   ;;  %s2399_s12 = smov %s1470_s13 }
  0xf2   : > { %p18_p7 = scmp.ge.s32.totalorder %s21_s17, 4   ;;  %s2400_s13 = smov %s1474_s14 }
  0xf3   : > { %s2401_s14 = smov %s1633_s26  ;;  %s2402_s15 = smov %s1482_s16 }
  0xf4   : > { %s2403_s16 = smov %s2405_s5  ;;  %20 = sbr.rel (!%p18_p7) target bundleno = 8 (0x8), region = 101 }
  0xfb   :  { %1027 = vsyncpa [#allocation4], 1 }
  0xfc   :  { %1029 = vsyncpa [#allocation4 + $0x1], 1 }
  0xfd   :  { %1030 = vsyncpa [#allocation5], 1 }
  0xfe   :  { %1032 = vsyncpa [#allocation5 + $0x1], 1 }
  0xff   :  { %1033 = vsyncpa [#allocation6], 1 }
 0x100   :  { %1035 = vsyncpa [#allocation6 + $0x1], 1 }
 0x101   :  { %1036 = vsyncpa [#allocation7], 1 }
 0x102   :  { %1038 = vsyncpa [#allocation7 + $0x1], 1 }

</bundles_post_ra>
